<compile_context>
chip_gen: v7x
topology: tpu7x:2x2x1
jax: 0.10.0
libtpu: 0.0.40
codegen_flags: <defaults>
</compile_context>

<pallas_src>
import functools
import math

import jax
import jax.numpy as jnp
from jax.experimental import pallas as pl
from jax.experimental.pallas import tpu as pltpu


def _round_up(n, m):
    return ((n + m - 1) // m) * m


def _scagru_kernel(
    x_ref,      # (T, Bp, Ip)   mm_dtype, all timesteps resident in VMEM
    h0_ref,     # (Bp, Hp)      f32 initial state
    wx_ref,     # (Ip, 3*Hp)    packed [Wzx | Wrx | Whx]
    wzr_ref,    # (Hp, 2*Hp)    packed [Wzh | Wrh]
    whh_ref,    # (Hp, Hp)
    wch_ref,    # (Hp, Hp)
    bzr_ref,    # (1, 2*Hp)     f32 packed [bz | br]
    bh_ref,     # (1, Hp)       f32
    bc_ref,     # (1, Hp)       f32
    out_ref,    # (Bp, Hp)      f32
    xproj_scr,  # VMEM scratch (T, Bp, 3*Hp) f32: x proj with (bias + c) folded in
    *,
    unroll,
):
    T, Bp, Ip = x_ref.shape
    Hp = out_ref.shape[1]
    mm_dtype = wzr_ref.dtype

    h0 = h0_ref[...]

    # c = relu(state @ W_ch + b_c): computed once, constant over time.
    c = jnp.maximum(
        jnp.dot(h0.astype(wch_ref.dtype), wch_ref[...],
                preferred_element_type=jnp.float32)
        + bc_ref[...],
        0.0,
    )

    # Hoisted input projection: one GEMM for every timestep at once.
    # Ip is lane-aligned (128), so merging (T, Bp) is layout-free.
    x2d = x_ref[...].reshape(T * Bp, Ip)
    xproj = jnp.dot(x2d, wx_ref[...], preferred_element_type=jnp.float32)

    # Fold the loop-invariant (bias + c) terms into xproj once; step() then
    # only does matmul + activation + state update.
    bzr_c = bzr_ref[...] + jnp.concatenate([c, c], axis=-1)   # (Bp, 2*Hp)
    bh_c = bh_ref[...] + c                                    # (Bp, Hp)
    bias_all = jnp.concatenate([bzr_c, bh_c], axis=-1)        # (Bp, 3*Hp)
    xproj_scr[...] = xproj.reshape(T, Bp, 3 * Hp) + bias_all[None]

    def step(t, h):
        xp = xproj_scr[t]                                     # (Bp, 3*Hp)
        pre_zr = (
            jnp.dot(h.astype(mm_dtype), wzr_ref[...],
                    preferred_element_type=jnp.float32)
            + xp[:, : 2 * Hp]
        )
        # Only r is on the critical path into the Whh matmul.
        r = jax.nn.sigmoid(pre_zr[:, Hp:])
        # note: PyTorch `h * r @ W_hh` parses as `(h * r) @ W_hh`
        pre_h = (
            jnp.dot((h * r).astype(mm_dtype), whh_ref[...],
                    preferred_element_type=jnp.float32)
            + xp[:, 2 * Hp:]
        )
        # z overlaps the Whh matmul on the EUP.
        z = jax.nn.sigmoid(pre_zr[:, :Hp])
        ht = jnp.tanh(pre_h)
        return h + z * (ht - h)     # == (1 - z) * h + z * ht

    h = jax.lax.fori_loop(0, T, step, h0, unroll=unroll)
    out_ref[...] = h.astype(out_ref.dtype)


def scagru_forward(x, state, params):
    """x: (T, B, indim), state: (B, hidim). Returns (B, hidim) float32."""
    T, B, I = x.shape
    _, H = state.shape
    wzh, wzx, bz, wrh, wrx, br, whh, whx, bh, wch, bc = params

    f32 = jnp.float32
    # bf16 matmul operands only pay off once H is non-trivial; keep f32 at
    # small H so the 1e-4 reference check holds exactly.
    mm_dtype = jnp.bfloat16 if H >= 256 else f32

    Bp = _round_up(B, 8)      # sublane multiple
    Hp = _round_up(H, 128)    # lane multiple
    Ip = _round_up(I, 128)    # lane multiple (last dim of x maps to lanes)

    def pad2(a, rows, cols, dtype):
        a = a.astype(f32)
        a = jnp.pad(a, ((0, rows - a.shape[0]), (0, cols - a.shape[1])))
        return a.astype(dtype)

    # Zero-padding keeps the math exact: padded h columns stay 0 through the
    # recurrence; padded batch rows are sliced off and never read.
    x_p = jnp.pad(x.astype(f32), ((0, 0), (0, Bp - B), (0, Ip - I))).astype(mm_dtype)
    h0_p = pad2(state, Bp, Hp, f32)

    wx = jnp.concatenate(
        [pad2(wzx, Ip, Hp, mm_dtype), pad2(wrx, Ip, Hp, mm_dtype),
         pad2(whx, Ip, Hp, mm_dtype)], axis=1)                                # (Ip, 3Hp)
    wzr = jnp.concatenate(
        [pad2(wzh, Hp, Hp, mm_dtype), pad2(wrh, Hp, Hp, mm_dtype)], axis=1)   # (Hp, 2Hp)
    whh_p = pad2(whh, Hp, Hp, mm_dtype)
    wch_p = pad2(wch, Hp, Hp, mm_dtype)
    bzr = jnp.concatenate([pad2(bz, 1, Hp, f32), pad2(br, 1, Hp, f32)], axis=1)  # (1, 2Hp)
    bh_p = pad2(bh, 1, Hp, f32)
    bc_p = pad2(bc, 1, Hp, f32)

    operands = (x_p, h0_p, wx, wzr, whh_p, wch_p, bzr, bh_p, bc_p)

    # Honest VMEM budget: operands + output + xproj scratch, plus headroom
    # for in-kernel temporaries.  (No grid -> no double-buffering.)
    need_bytes = sum(int(a.size) * a.dtype.itemsize for a in operands)
    need_bytes += Bp * Hp * 4                      # output
    need_bytes += T * Bp * 3 * Hp * 4              # xproj scratch
    vmem_limit = int(min(max(need_bytes * 2 + (2 << 20), 4 << 20), 100 << 20))

    # Partial unroll for long recurrences (code size / vreg pressure); full
    # unroll when short.
    unroll = True if T <= 16 else 8

    vmem_spec = pl.BlockSpec(memory_space=pltpu.MemorySpace.VMEM)

    out = pl.pallas_call(
        functools.partial(_scagru_kernel, unroll=unroll),
        out_shape=jax.ShapeDtypeStruct((Bp, Hp), f32),
        in_specs=[vmem_spec] * 9,
        out_specs=vmem_spec,
        scratch_shapes=[pltpu.VMEM((T, Bp, 3 * Hp), f32)],
        compiler_params=pltpu.CompilerParams(
            vmem_limit_bytes=vmem_limit,
        ),
    )(*operands)

    return out[:B, :H]


def scagru_reference(x, state, params):
    """Pure-JAX reference mirroring the PyTorch forward."""
    (wzh, wzx, bz, wrh, wrx, br, whh, whx, bh, wch, bc) = params
    h = state
    c = jnp.maximum(state @ wch + bc, 0.0)
    for t in range(x.shape[0]):
        xt = x[t]
        z = jax.nn.sigmoid(h @ wzh + xt @ wzx + bz + c)
        r = jax.nn.sigmoid(h @ wrh + xt @ wrx + br + c)
        ht = jnp.tanh((h * r) @ whh + xt @ whx + bh + c)
        h = (1.0 - z) * h + z * ht
    return h


def init_params(key, indim, hidim):
    stdv = 1.0 / math.sqrt(hidim)
    keys = jax.random.split(key, 11)
    u = lambda k, shape: jax.random.uniform(
        k, shape, dtype=jnp.float32, minval=-stdv, maxval=stdv
    )
    wzh = u(keys[0], (hidim, hidim)); wzx = u(keys[1], (indim, hidim)); bz = u(keys[2], (1, hidim))
    wrh = u(keys[3], (hidim, hidim)); wrx = u(keys[4], (indim, hidim)); br = u(keys[5], (1, hidim))
    whh = u(keys[6], (hidim, hidim)); whx = u(keys[7], (indim, hidim)); bh = u(keys[8], (1, hidim))
    wch = u(keys[9], (hidim, hidim));                                  bc = u(keys[10], (1, hidim))
    return (wzh, wzx, bz, wrh, wrx, br, whh, whx, bh, wch, bc)


if __name__ == "__main__":
    T, B, INDIM, HIDIM = 8, 4, 4, 32

    key = jax.random.PRNGKey(0)
    k_x, k_h, k_p = jax.random.split(key, 3)

    x = jax.random.normal(k_x, (T, B, INDIM), dtype=jnp.float32)
    state = jax.random.normal(k_h, (B, HIDIM), dtype=jnp.float32)
    params = init_params(k_p, INDIM, HIDIM)

    out = scagru_forward(x, state, params)
    out = jax.block_until_ready(out)

    ref = scagru_reference(x, state, params)
    assert out.shape == (B, HIDIM)
    assert jnp.allclose(out, ref, atol=1e-4, rtol=1e-4), "mismatch vs reference"

    print("KERNEL_OK")
</pallas_src>

<mosaic_0001>
module attributes {stable_mosaic.version = 11 : i64} {
  func.func @_scagru_kernel(%arg0: memref<8x8x128xf32, #tpu.memory_space<vmem>>, %arg1: memref<8x128xf32, #tpu.memory_space<vmem>>, %arg2: memref<128x384xf32, #tpu.memory_space<vmem>>, %arg3: memref<128x256xf32, #tpu.memory_space<vmem>>, %arg4: memref<128x128xf32, #tpu.memory_space<vmem>>, %arg5: memref<128x128xf32, #tpu.memory_space<vmem>>, %arg6: memref<1x256xf32, #tpu.memory_space<vmem>>, %arg7: memref<1x128xf32, #tpu.memory_space<vmem>>, %arg8: memref<1x128xf32, #tpu.memory_space<vmem>>, %arg9: memref<8x128xf32, #tpu.memory_space<vmem>>, %arg10: memref<8x8x384xf32, #tpu.memory_space<vmem>>) attributes {dimension_semantics = [], scalar_prefetch = 0 : i64, scratch_operands = 1 : i64, tpu.core_type = #tpu.core_type<tc>} {
    %c0 = arith.constant 0 : index
    %c0_0 = arith.constant 0 : index
    %0 = vector.load %arg1[%c0, %c0_0] : memref<8x128xf32, #tpu.memory_space<vmem>>, vector<8x128xf32>
    %c0_1 = arith.constant 0 : index
    %c0_2 = arith.constant 0 : index
    %1 = vector.load %arg5[%c0_1, %c0_2] : memref<128x128xf32, #tpu.memory_space<vmem>>, vector<128x128xf32>
    %cst = arith.constant dense<0.000000e+00> : vector<8x128xf32>
    %2 = tpu.matmul %0, %1, %cst {dimension_numbers = #tpu.dot_dimension_numbers<[1], [0], [0], [1], [0, 0, 1, 1], [], []>} : vector<8x128xf32>, vector<128x128xf32>, vector<8x128xf32> -> vector<8x128xf32>
    %c0_3 = arith.constant 0 : index
    %c0_4 = arith.constant 0 : index
    %3 = vector.load %arg8[%c0_3, %c0_4] : memref<1x128xf32, #tpu.memory_space<vmem>>, vector<1x128xf32>
    %4 = vector.broadcast %3 : vector<1x128xf32> to vector<8x128xf32>
    %5 = arith.addf %2, %4 : vector<8x128xf32>
    %cst_5 = arith.constant 0.000000e+00 : f32
    %6 = vector.broadcast %cst_5 : f32 to vector<8x128xf32>
    %7 = arith.maximumf %5, %6 : vector<8x128xf32>
    %c0_6 = arith.constant 0 : index
    %c0_7 = arith.constant 0 : index
    %c0_8 = arith.constant 0 : index
    %8 = vector.load %arg0[%c0_6, %c0_7, %c0_8] : memref<8x8x128xf32, #tpu.memory_space<vmem>>, vector<8x8x128xf32>
    %9 = vector.shape_cast %8 : vector<8x8x128xf32> to vector<64x128xf32>
    %c0_9 = arith.constant 0 : index
    %c0_10 = arith.constant 0 : index
    %10 = vector.load %arg2[%c0_9, %c0_10] : memref<128x384xf32, #tpu.memory_space<vmem>>, vector<128x384xf32>
    %cst_11 = arith.constant dense<0.000000e+00> : vector<64x384xf32>
    %11 = tpu.matmul %9, %10, %cst_11 {dimension_numbers = #tpu.dot_dimension_numbers<[1], [0], [0], [1], [0, 0, 1, 1], [], []>} : vector<64x128xf32>, vector<128x384xf32>, vector<64x384xf32> -> vector<64x384xf32>
    %c0_12 = arith.constant 0 : index
    %c0_13 = arith.constant 0 : index
    %12 = vector.load %arg6[%c0_12, %c0_13] : memref<1x256xf32, #tpu.memory_space<vmem>>, vector<1x256xf32>
    %13 = tpu.concatenate %7, %7 in 1 : vector<8x128xf32>, vector<8x128xf32> -> vector<8x256xf32>
    %14 = vector.broadcast %12 : vector<1x256xf32> to vector<8x256xf32>
    %15 = arith.addf %14, %13 : vector<8x256xf32>
    %c0_14 = arith.constant 0 : index
    %c0_15 = arith.constant 0 : index
    %16 = vector.load %arg7[%c0_14, %c0_15] : memref<1x128xf32, #tpu.memory_space<vmem>>, vector<1x128xf32>
    %17 = vector.broadcast %16 : vector<1x128xf32> to vector<8x128xf32>
    %18 = arith.addf %17, %7 : vector<8x128xf32>
    %19 = tpu.concatenate %15, %18 in 1 : vector<8x256xf32>, vector<8x128xf32> -> vector<8x384xf32>
    %20 = vector.shape_cast %11 : vector<64x384xf32> to vector<8x8x384xf32>
    %21 = vector.shape_cast %19 : vector<8x384xf32> to vector<1x8x384xf32>
    %22 = vector.broadcast %21 : vector<1x8x384xf32> to vector<8x8x384xf32>
    %23 = arith.addf %20, %22 : vector<8x8x384xf32>
    %c0_16 = arith.constant 0 : index
    %c0_17 = arith.constant 0 : index
    %c0_18 = arith.constant 0 : index
    %24 = vector.load %arg10[%c0_16, %c0_17, %c0_18] : memref<8x8x384xf32, #tpu.memory_space<vmem>>, vector<8x8x384xf32>
    tpu.vector_store %arg10[%c0_16, %c0_17, %c0_18], %23 {strides = array<i32>} : memref<8x8x384xf32, #tpu.memory_space<vmem>>, vector<8x8x384xf32>,
    %c0_i32 = arith.constant 0 : i32
    %25 = arith.index_cast %c0_i32 : i32 to index
    %c0_19 = arith.constant 0 : index
    %c0_20 = arith.constant 0 : index
    %26 = vector.load %arg10[%25, %c0_19, %c0_20] : memref<8x8x384xf32, #tpu.memory_space<vmem>>, vector<1x8x384xf32>
    %27 = vector.shape_cast %26 : vector<1x8x384xf32> to vector<8x384xf32>
    %c0_21 = arith.constant 0 : index
    %c0_22 = arith.constant 0 : index
    %28 = vector.load %arg3[%c0_21, %c0_22] : memref<128x256xf32, #tpu.memory_space<vmem>>, vector<128x256xf32>
    %cst_23 = arith.constant dense<0.000000e+00> : vector<8x256xf32>
    %29 = tpu.matmul %0, %28, %cst_23 {dimension_numbers = #tpu.dot_dimension_numbers<[1], [0], [0], [1], [0, 0, 1, 1], [], []>} : vector<8x128xf32>, vector<128x256xf32>, vector<8x256xf32> -> vector<8x256xf32>
    %30 = vector.extract_strided_slice %27 {offsets = [0, 0], sizes = [8, 256], strides = [1, 1]} : vector<8x384xf32> to vector<8x256xf32>
    %31 = arith.addf %29, %30 : vector<8x256xf32>
    %32 = vector.extract_strided_slice %31 {offsets = [0, 128], sizes = [8, 128], strides = [1, 1]} : vector<8x256xf32> to vector<8x128xf32>
    %33 = arith.negf %32 : vector<8x128xf32>
    %34 = math.exp %33 : vector<8x128xf32>
    %cst_24 = arith.constant 1.000000e+00 : f32
    %35 = vector.broadcast %cst_24 : f32 to vector<8x128xf32>
    %36 = arith.addf %35, %34 : vector<8x128xf32>
    %37 = arith.divf %35, %36 : vector<8x128xf32>
    %38 = arith.mulf %0, %37 : vector<8x128xf32>
    %c0_25 = arith.constant 0 : index
    %c0_26 = arith.constant 0 : index
    %39 = vector.load %arg4[%c0_25, %c0_26] : memref<128x128xf32, #tpu.memory_space<vmem>>, vector<128x128xf32>
    %cst_27 = arith.constant dense<0.000000e+00> : vector<8x128xf32>
    %40 = tpu.matmul %38, %39, %cst_27 {dimension_numbers = #tpu.dot_dimension_numbers<[1], [0], [0], [1], [0, 0, 1, 1], [], []>} : vector<8x128xf32>, vector<128x128xf32>, vector<8x128xf32> -> vector<8x128xf32>
    %41 = vector.extract_strided_slice %27 {offsets = [0, 256], sizes = [8, 128], strides = [1, 1]} : vector<8x384xf32> to vector<8x128xf32>
    %42 = arith.addf %40, %41 : vector<8x128xf32>
    %43 = vector.extract_strided_slice %31 {offsets = [0, 0], sizes = [8, 128], strides = [1, 1]} : vector<8x256xf32> to vector<8x128xf32>
    %44 = arith.negf %43 : vector<8x128xf32>
    %45 = math.exp %44 : vector<8x128xf32>
    %cst_28 = arith.constant 1.000000e+00 : f32
    %46 = vector.broadcast %cst_28 : f32 to vector<8x128xf32>
    %47 = arith.addf %46, %45 : vector<8x128xf32>
    %48 = arith.divf %46, %47 : vector<8x128xf32>
    %49 = math.tanh %42 : vector<8x128xf32>
    %50 = arith.subf %49, %0 : vector<8x128xf32>
    %51 = arith.mulf %48, %50 : vector<8x128xf32>
    %52 = arith.addf %0, %51 : vector<8x128xf32>
    %c1_i32 = arith.constant 1 : i32
    %53 = arith.index_cast %c1_i32 : i32 to index
    %c0_29 = arith.constant 0 : index
    %c0_30 = arith.constant 0 : index
    %54 = vector.load %arg10[%53, %c0_29, %c0_30] : memref<8x8x384xf32, #tpu.memory_space<vmem>>, vector<1x8x384xf32>
    %55 = vector.shape_cast %54 : vector<1x8x384xf32> to vector<8x384xf32>
    %c0_31 = arith.constant 0 : index
    %c0_32 = arith.constant 0 : index
    %56 = vector.load %arg3[%c0_31, %c0_32] : memref<128x256xf32, #tpu.memory_space<vmem>>, vector<128x256xf32>
    %cst_33 = arith.constant dense<0.000000e+00> : vector<8x256xf32>
    %57 = tpu.matmul %52, %56, %cst_33 {dimension_numbers = #tpu.dot_dimension_numbers<[1], [0], [0], [1], [0, 0, 1, 1], [], []>} : vector<8x128xf32>, vector<128x256xf32>, vector<8x256xf32> -> vector<8x256xf32>
    %58 = vector.extract_strided_slice %55 {offsets = [0, 0], sizes = [8, 256], strides = [1, 1]} : vector<8x384xf32> to vector<8x256xf32>
    %59 = arith.addf %57, %58 : vector<8x256xf32>
    %60 = vector.extract_strided_slice %59 {offsets = [0, 128], sizes = [8, 128], strides = [1, 1]} : vector<8x256xf32> to vector<8x128xf32>
    %61 = arith.negf %60 : vector<8x128xf32>
    %62 = math.exp %61 : vector<8x128xf32>
    %cst_34 = arith.constant 1.000000e+00 : f32
    %63 = vector.broadcast %cst_34 : f32 to vector<8x128xf32>
    %64 = arith.addf %63, %62 : vector<8x128xf32>
    %65 = arith.divf %63, %64 : vector<8x128xf32>
    %66 = arith.mulf %52, %65 : vector<8x128xf32>
    %c0_35 = arith.constant 0 : index
    %c0_36 = arith.constant 0 : index
    %67 = vector.load %arg4[%c0_35, %c0_36] : memref<128x128xf32, #tpu.memory_space<vmem>>, vector<128x128xf32>
    %cst_37 = arith.constant dense<0.000000e+00> : vector<8x128xf32>
    %68 = tpu.matmul %66, %67, %cst_37 {dimension_numbers = #tpu.dot_dimension_numbers<[1], [0], [0], [1], [0, 0, 1, 1], [], []>} : vector<8x128xf32>, vector<128x128xf32>, vector<8x128xf32> -> vector<8x128xf32>
    %69 = vector.extract_strided_slice %55 {offsets = [0, 256], sizes = [8, 128], strides = [1, 1]} : vector<8x384xf32> to vector<8x128xf32>
    %70 = arith.addf %68, %69 : vector<8x128xf32>
    %71 = vector.extract_strided_slice %59 {offsets = [0, 0], sizes = [8, 128], strides = [1, 1]} : vector<8x256xf32> to vector<8x128xf32>
    %72 = arith.negf %71 : vector<8x128xf32>
    %73 = math.exp %72 : vector<8x128xf32>
    %cst_38 = arith.constant 1.000000e+00 : f32
    %74 = vector.broadcast %cst_38 : f32 to vector<8x128xf32>
    %75 = arith.addf %74, %73 : vector<8x128xf32>
    %76 = arith.divf %74, %75 : vector<8x128xf32>
    %77 = math.tanh %70 : vector<8x128xf32>
    %78 = arith.subf %77, %52 : vector<8x128xf32>
    %79 = arith.mulf %76, %78 : vector<8x128xf32>
    %80 = arith.addf %52, %79 : vector<8x128xf32>
    %c2_i32 = arith.constant 2 : i32
    %81 = arith.index_cast %c2_i32 : i32 to index
    %c0_39 = arith.constant 0 : index
    %c0_40 = arith.constant 0 : index
    %82 = vector.load %arg10[%81, %c0_39, %c0_40] : memref<8x8x384xf32, #tpu.memory_space<vmem>>, vector<1x8x384xf32>
    %83 = vector.shape_cast %82 : vector<1x8x384xf32> to vector<8x384xf32>
    %c0_41 = arith.constant 0 : index
    %c0_42 = arith.constant 0 : index
    %84 = vector.load %arg3[%c0_41, %c0_42] : memref<128x256xf32, #tpu.memory_space<vmem>>, vector<128x256xf32>
    %cst_43 = arith.constant dense<0.000000e+00> : vector<8x256xf32>
    %85 = tpu.matmul %80, %84, %cst_43 {dimension_numbers = #tpu.dot_dimension_numbers<[1], [0], [0], [1], [0, 0, 1, 1], [], []>} : vector<8x128xf32>, vector<128x256xf32>, vector<8x256xf32> -> vector<8x256xf32>
    %86 = vector.extract_strided_slice %83 {offsets = [0, 0], sizes = [8, 256], strides = [1, 1]} : vector<8x384xf32> to vector<8x256xf32>
    %87 = arith.addf %85, %86 : vector<8x256xf32>
    %88 = vector.extract_strided_slice %87 {offsets = [0, 128], sizes = [8, 128], strides = [1, 1]} : vector<8x256xf32> to vector<8x128xf32>
    %89 = arith.negf %88 : vector<8x128xf32>
    %90 = math.exp %89 : vector<8x128xf32>
    %cst_44 = arith.constant 1.000000e+00 : f32
    %91 = vector.broadcast %cst_44 : f32 to vector<8x128xf32>
    %92 = arith.addf %91, %90 : vector<8x128xf32>
    %93 = arith.divf %91, %92 : vector<8x128xf32>
    %94 = arith.mulf %80, %93 : vector<8x128xf32>
    %c0_45 = arith.constant 0 : index
    %c0_46 = arith.constant 0 : index
    %95 = vector.load %arg4[%c0_45, %c0_46] : memref<128x128xf32, #tpu.memory_space<vmem>>, vector<128x128xf32>
    %cst_47 = arith.constant dense<0.000000e+00> : vector<8x128xf32>
    %96 = tpu.matmul %94, %95, %cst_47 {dimension_numbers = #tpu.dot_dimension_numbers<[1], [0], [0], [1], [0, 0, 1, 1], [], []>} : vector<8x128xf32>, vector<128x128xf32>, vector<8x128xf32> -> vector<8x128xf32>
    %97 = vector.extract_strided_slice %83 {offsets = [0, 256], sizes = [8, 128], strides = [1, 1]} : vector<8x384xf32> to vector<8x128xf32>
    %98 = arith.addf %96, %97 : vector<8x128xf32>
    %99 = vector.extract_strided_slice %87 {offsets = [0, 0], sizes = [8, 128], strides = [1, 1]} : vector<8x256xf32> to vector<8x128xf32>
    %100 = arith.negf %99 : vector<8x128xf32>
    %101 = math.exp %100 : vector<8x128xf32>
    %cst_48 = arith.constant 1.000000e+00 : f32
    %102 = vector.broadcast %cst_48 : f32 to vector<8x128xf32>
    %103 = arith.addf %102, %101 : vector<8x128xf32>
    %104 = arith.divf %102, %103 : vector<8x128xf32>
    %105 = math.tanh %98 : vector<8x128xf32>
    %106 = arith.subf %105, %80 : vector<8x128xf32>
    %107 = arith.mulf %104, %106 : vector<8x128xf32>
    %108 = arith.addf %80, %107 : vector<8x128xf32>
    %c3_i32 = arith.constant 3 : i32
    %109 = arith.index_cast %c3_i32 : i32 to index
    %c0_49 = arith.constant 0 : index
    %c0_50 = arith.constant 0 : index
    %110 = vector.load %arg10[%109, %c0_49, %c0_50] : memref<8x8x384xf32, #tpu.memory_space<vmem>>, vector<1x8x384xf32>
    %111 = vector.shape_cast %110 : vector<1x8x384xf32> to vector<8x384xf32>
    %c0_51 = arith.constant 0 : index
    %c0_52 = arith.constant 0 : index
    %112 = vector.load %arg3[%c0_51, %c0_52] : memref<128x256xf32, #tpu.memory_space<vmem>>, vector<128x256xf32>
    %cst_53 = arith.constant dense<0.000000e+00> : vector<8x256xf32>
    %113 = tpu.matmul %108, %112, %cst_53 {dimension_numbers = #tpu.dot_dimension_numbers<[1], [0], [0], [1], [0, 0, 1, 1], [], []>} : vector<8x128xf32>, vector<128x256xf32>, vector<8x256xf32> -> vector<8x256xf32>
    %114 = vector.extract_strided_slice %111 {offsets = [0, 0], sizes = [8, 256], strides = [1, 1]} : vector<8x384xf32> to vector<8x256xf32>
    %115 = arith.addf %113, %114 : vector<8x256xf32>
    %116 = vector.extract_strided_slice %115 {offsets = [0, 128], sizes = [8, 128], strides = [1, 1]} : vector<8x256xf32> to vector<8x128xf32>
    %117 = arith.negf %116 : vector<8x128xf32>
    %118 = math.exp %117 : vector<8x128xf32>
    %cst_54 = arith.constant 1.000000e+00 : f32
    %119 = vector.broadcast %cst_54 : f32 to vector<8x128xf32>
    %120 = arith.addf %119, %118 : vector<8x128xf32>
    %121 = arith.divf %119, %120 : vector<8x128xf32>
    %122 = arith.mulf %108, %121 : vector<8x128xf32>
    %c0_55 = arith.constant 0 : index
    %c0_56 = arith.constant 0 : index
    %123 = vector.load %arg4[%c0_55, %c0_56] : memref<128x128xf32, #tpu.memory_space<vmem>>, vector<128x128xf32>
    %cst_57 = arith.constant dense<0.000000e+00> : vector<8x128xf32>
    %124 = tpu.matmul %122, %123, %cst_57 {dimension_numbers = #tpu.dot_dimension_numbers<[1], [0], [0], [1], [0, 0, 1, 1], [], []>} : vector<8x128xf32>, vector<128x128xf32>, vector<8x128xf32> -> vector<8x128xf32>
    %125 = vector.extract_strided_slice %111 {offsets = [0, 256], sizes = [8, 128], strides = [1, 1]} : vector<8x384xf32> to vector<8x128xf32>
    %126 = arith.addf %124, %125 : vector<8x128xf32>
    %127 = vector.extract_strided_slice %115 {offsets = [0, 0], sizes = [8, 128], strides = [1, 1]} : vector<8x256xf32> to vector<8x128xf32>
    %128 = arith.negf %127 : vector<8x128xf32>
    %129 = math.exp %128 : vector<8x128xf32>
    %cst_58 = arith.constant 1.000000e+00 : f32
    %130 = vector.broadcast %cst_58 : f32 to vector<8x128xf32>
    %131 = arith.addf %130, %129 : vector<8x128xf32>
    %132 = arith.divf %130, %131 : vector<8x128xf32>
    %133 = math.tanh %126 : vector<8x128xf32>
    %134 = arith.subf %133, %108 : vector<8x128xf32>
    %135 = arith.mulf %132, %134 : vector<8x128xf32>
    %136 = arith.addf %108, %135 : vector<8x128xf32>
    %c4_i32 = arith.constant 4 : i32
    %137 = arith.index_cast %c4_i32 : i32 to index
    %c0_59 = arith.constant 0 : index
    %c0_60 = arith.constant 0 : index
    %138 = vector.load %arg10[%137, %c0_59, %c0_60] : memref<8x8x384xf32, #tpu.memory_space<vmem>>, vector<1x8x384xf32>
    %139 = vector.shape_cast %138 : vector<1x8x384xf32> to vector<8x384xf32>
    %c0_61 = arith.constant 0 : index
    %c0_62 = arith.constant 0 : index
    %140 = vector.load %arg3[%c0_61, %c0_62] : memref<128x256xf32, #tpu.memory_space<vmem>>, vector<128x256xf32>
    %cst_63 = arith.constant dense<0.000000e+00> : vector<8x256xf32>
    %141 = tpu.matmul %136, %140, %cst_63 {dimension_numbers = #tpu.dot_dimension_numbers<[1], [0], [0], [1], [0, 0, 1, 1], [], []>} : vector<8x128xf32>, vector<128x256xf32>, vector<8x256xf32> -> vector<8x256xf32>
    %142 = vector.extract_strided_slice %139 {offsets = [0, 0], sizes = [8, 256], strides = [1, 1]} : vector<8x384xf32> to vector<8x256xf32>
    %143 = arith.addf %141, %142 : vector<8x256xf32>
    %144 = vector.extract_strided_slice %143 {offsets = [0, 128], sizes = [8, 128], strides = [1, 1]} : vector<8x256xf32> to vector<8x128xf32>
    %145 = arith.negf %144 : vector<8x128xf32>
    %146 = math.exp %145 : vector<8x128xf32>
    %cst_64 = arith.constant 1.000000e+00 : f32
    %147 = vector.broadcast %cst_64 : f32 to vector<8x128xf32>
    %148 = arith.addf %147, %146 : vector<8x128xf32>
    %149 = arith.divf %147, %148 : vector<8x128xf32>
    %150 = arith.mulf %136, %149 : vector<8x128xf32>
    %c0_65 = arith.constant 0 : index
    %c0_66 = arith.constant 0 : index
    %151 = vector.load %arg4[%c0_65, %c0_66] : memref<128x128xf32, #tpu.memory_space<vmem>>, vector<128x128xf32>
    %cst_67 = arith.constant dense<0.000000e+00> : vector<8x128xf32>
    %152 = tpu.matmul %150, %151, %cst_67 {dimension_numbers = #tpu.dot_dimension_numbers<[1], [0], [0], [1], [0, 0, 1, 1], [], []>} : vector<8x128xf32>, vector<128x128xf32>, vector<8x128xf32> -> vector<8x128xf32>
    %153 = vector.extract_strided_slice %139 {offsets = [0, 256], sizes = [8, 128], strides = [1, 1]} : vector<8x384xf32> to vector<8x128xf32>
    %154 = arith.addf %152, %153 : vector<8x128xf32>
    %155 = vector.extract_strided_slice %143 {offsets = [0, 0], sizes = [8, 128], strides = [1, 1]} : vector<8x256xf32> to vector<8x128xf32>
    %156 = arith.negf %155 : vector<8x128xf32>
    %157 = math.exp %156 : vector<8x128xf32>
    %cst_68 = arith.constant 1.000000e+00 : f32
    %158 = vector.broadcast %cst_68 : f32 to vector<8x128xf32>
    %159 = arith.addf %158, %157 : vector<8x128xf32>
    %160 = arith.divf %158, %159 : vector<8x128xf32>
    %161 = math.tanh %154 : vector<8x128xf32>
    %162 = arith.subf %161, %136 : vector<8x128xf32>
    %163 = arith.mulf %160, %162 : vector<8x128xf32>
    %164 = arith.addf %136, %163 : vector<8x128xf32>
    %c5_i32 = arith.constant 5 : i32
    %165 = arith.index_cast %c5_i32 : i32 to index
    %c0_69 = arith.constant 0 : index
    %c0_70 = arith.constant 0 : index
    %166 = vector.load %arg10[%165, %c0_69, %c0_70] : memref<8x8x384xf32, #tpu.memory_space<vmem>>, vector<1x8x384xf32>
    %167 = vector.shape_cast %166 : vector<1x8x384xf32> to vector<8x384xf32>
    %c0_71 = arith.constant 0 : index
    %c0_72 = arith.constant 0 : index
    %168 = vector.load %arg3[%c0_71, %c0_72] : memref<128x256xf32, #tpu.memory_space<vmem>>, vector<128x256xf32>
    %cst_73 = arith.constant dense<0.000000e+00> : vector<8x256xf32>
    %169 = tpu.matmul %164, %168, %cst_73 {dimension_numbers = #tpu.dot_dimension_numbers<[1], [0], [0], [1], [0, 0, 1, 1], [], []>} : vector<8x128xf32>, vector<128x256xf32>, vector<8x256xf32> -> vector<8x256xf32>
    %170 = vector.extract_strided_slice %167 {offsets = [0, 0], sizes = [8, 256], strides = [1, 1]} : vector<8x384xf32> to vector<8x256xf32>
    %171 = arith.addf %169, %170 : vector<8x256xf32>
    %172 = vector.extract_strided_slice %171 {offsets = [0, 128], sizes = [8, 128], strides = [1, 1]} : vector<8x256xf32> to vector<8x128xf32>
    %173 = arith.negf %172 : vector<8x128xf32>
    %174 = math.exp %173 : vector<8x128xf32>
    %cst_74 = arith.constant 1.000000e+00 : f32
    %175 = vector.broadcast %cst_74 : f32 to vector<8x128xf32>
    %176 = arith.addf %175, %174 : vector<8x128xf32>
    %177 = arith.divf %175, %176 : vector<8x128xf32>
    %178 = arith.mulf %164, %177 : vector<8x128xf32>
    %c0_75 = arith.constant 0 : index
    %c0_76 = arith.constant 0 : index
    %179 = vector.load %arg4[%c0_75, %c0_76] : memref<128x128xf32, #tpu.memory_space<vmem>>, vector<128x128xf32>
    %cst_77 = arith.constant dense<0.000000e+00> : vector<8x128xf32>
    %180 = tpu.matmul %178, %179, %cst_77 {dimension_numbers = #tpu.dot_dimension_numbers<[1], [0], [0], [1], [0, 0, 1, 1], [], []>} : vector<8x128xf32>, vector<128x128xf32>, vector<8x128xf32> -> vector<8x128xf32>
    %181 = vector.extract_strided_slice %167 {offsets = [0, 256], sizes = [8, 128], strides = [1, 1]} : vector<8x384xf32> to vector<8x128xf32>
    %182 = arith.addf %180, %181 : vector<8x128xf32>
    %183 = vector.extract_strided_slice %171 {offsets = [0, 0], sizes = [8, 128], strides = [1, 1]} : vector<8x256xf32> to vector<8x128xf32>
    %184 = arith.negf %183 : vector<8x128xf32>
    %185 = math.exp %184 : vector<8x128xf32>
    %cst_78 = arith.constant 1.000000e+00 : f32
    %186 = vector.broadcast %cst_78 : f32 to vector<8x128xf32>
    %187 = arith.addf %186, %185 : vector<8x128xf32>
    %188 = arith.divf %186, %187 : vector<8x128xf32>
    %189 = math.tanh %182 : vector<8x128xf32>
    %190 = arith.subf %189, %164 : vector<8x128xf32>
    %191 = arith.mulf %188, %190 : vector<8x128xf32>
    %192 = arith.addf %164, %191 : vector<8x128xf32>
    %c6_i32 = arith.constant 6 : i32
    %193 = arith.index_cast %c6_i32 : i32 to index
    %c0_79 = arith.constant 0 : index
    %c0_80 = arith.constant 0 : index
    %194 = vector.load %arg10[%193, %c0_79, %c0_80] : memref<8x8x384xf32, #tpu.memory_space<vmem>>, vector<1x8x384xf32>
    %195 = vector.shape_cast %194 : vector<1x8x384xf32> to vector<8x384xf32>
    %c0_81 = arith.constant 0 : index
    %c0_82 = arith.constant 0 : index
    %196 = vector.load %arg3[%c0_81, %c0_82] : memref<128x256xf32, #tpu.memory_space<vmem>>, vector<128x256xf32>
    %cst_83 = arith.constant dense<0.000000e+00> : vector<8x256xf32>
    %197 = tpu.matmul %192, %196, %cst_83 {dimension_numbers = #tpu.dot_dimension_numbers<[1], [0], [0], [1], [0, 0, 1, 1], [], []>} : vector<8x128xf32>, vector<128x256xf32>, vector<8x256xf32> -> vector<8x256xf32>
    %198 = vector.extract_strided_slice %195 {offsets = [0, 0], sizes = [8, 256], strides = [1, 1]} : vector<8x384xf32> to vector<8x256xf32>
    %199 = arith.addf %197, %198 : vector<8x256xf32>
    %200 = vector.extract_strided_slice %199 {offsets = [0, 128], sizes = [8, 128], strides = [1, 1]} : vector<8x256xf32> to vector<8x128xf32>
    %201 = arith.negf %200 : vector<8x128xf32>
    %202 = math.exp %201 : vector<8x128xf32>
    %cst_84 = arith.constant 1.000000e+00 : f32
    %203 = vector.broadcast %cst_84 : f32 to vector<8x128xf32>
    %204 = arith.addf %203, %202 : vector<8x128xf32>
    %205 = arith.divf %203, %204 : vector<8x128xf32>
    %206 = arith.mulf %192, %205 : vector<8x128xf32>
    %c0_85 = arith.constant 0 : index
    %c0_86 = arith.constant 0 : index
    %207 = vector.load %arg4[%c0_85, %c0_86] : memref<128x128xf32, #tpu.memory_space<vmem>>, vector<128x128xf32>
    %cst_87 = arith.constant dense<0.000000e+00> : vector<8x128xf32>
    %208 = tpu.matmul %206, %207, %cst_87 {dimension_numbers = #tpu.dot_dimension_numbers<[1], [0], [0], [1], [0, 0, 1, 1], [], []>} : vector<8x128xf32>, vector<128x128xf32>, vector<8x128xf32> -> vector<8x128xf32>
    %209 = vector.extract_strided_slice %195 {offsets = [0, 256], sizes = [8, 128], strides = [1, 1]} : vector<8x384xf32> to vector<8x128xf32>
    %210 = arith.addf %208, %209 : vector<8x128xf32>
    %211 = vector.extract_strided_slice %199 {offsets = [0, 0], sizes = [8, 128], strides = [1, 1]} : vector<8x256xf32> to vector<8x128xf32>
    %212 = arith.negf %211 : vector<8x128xf32>
    %213 = math.exp %212 : vector<8x128xf32>
    %cst_88 = arith.constant 1.000000e+00 : f32
    %214 = vector.broadcast %cst_88 : f32 to vector<8x128xf32>
    %215 = arith.addf %214, %213 : vector<8x128xf32>
    %216 = arith.divf %214, %215 : vector<8x128xf32>
    %217 = math.tanh %210 : vector<8x128xf32>
    %218 = arith.subf %217, %192 : vector<8x128xf32>
    %219 = arith.mulf %216, %218 : vector<8x128xf32>
    %220 = arith.addf %192, %219 : vector<8x128xf32>
    %c7_i32 = arith.constant 7 : i32
    %221 = arith.index_cast %c7_i32 : i32 to index
    %c0_89 = arith.constant 0 : index
    %c0_90 = arith.constant 0 : index
    %222 = vector.load %arg10[%221, %c0_89, %c0_90] : memref<8x8x384xf32, #tpu.memory_space<vmem>>, vector<1x8x384xf32>
    %223 = vector.shape_cast %222 : vector<1x8x384xf32> to vector<8x384xf32>
    %c0_91 = arith.constant 0 : index
    %c0_92 = arith.constant 0 : index
    %224 = vector.load %arg3[%c0_91, %c0_92] : memref<128x256xf32, #tpu.memory_space<vmem>>, vector<128x256xf32>
    %cst_93 = arith.constant dense<0.000000e+00> : vector<8x256xf32>
    %225 = tpu.matmul %220, %224, %cst_93 {dimension_numbers = #tpu.dot_dimension_numbers<[1], [0], [0], [1], [0, 0, 1, 1], [], []>} : vector<8x128xf32>, vector<128x256xf32>, vector<8x256xf32> -> vector<8x256xf32>
    %226 = vector.extract_strided_slice %223 {offsets = [0, 0], sizes = [8, 256], strides = [1, 1]} : vector<8x384xf32> to vector<8x256xf32>
    %227 = arith.addf %225, %226 : vector<8x256xf32>
    %228 = vector.extract_strided_slice %227 {offsets = [0, 128], sizes = [8, 128], strides = [1, 1]} : vector<8x256xf32> to vector<8x128xf32>
    %229 = arith.negf %228 : vector<8x128xf32>
    %230 = math.exp %229 : vector<8x128xf32>
    %cst_94 = arith.constant 1.000000e+00 : f32
    %231 = vector.broadcast %cst_94 : f32 to vector<8x128xf32>
    %232 = arith.addf %231, %230 : vector<8x128xf32>
    %233 = arith.divf %231, %232 : vector<8x128xf32>
    %234 = arith.mulf %220, %233 : vector<8x128xf32>
    %c0_95 = arith.constant 0 : index
    %c0_96 = arith.constant 0 : index
    %235 = vector.load %arg4[%c0_95, %c0_96] : memref<128x128xf32, #tpu.memory_space<vmem>>, vector<128x128xf32>
    %cst_97 = arith.constant dense<0.000000e+00> : vector<8x128xf32>
    %236 = tpu.matmul %234, %235, %cst_97 {dimension_numbers = #tpu.dot_dimension_numbers<[1], [0], [0], [1], [0, 0, 1, 1], [], []>} : vector<8x128xf32>, vector<128x128xf32>, vector<8x128xf32> -> vector<8x128xf32>
    %237 = vector.extract_strided_slice %223 {offsets = [0, 256], sizes = [8, 128], strides = [1, 1]} : vector<8x384xf32> to vector<8x128xf32>
    %238 = arith.addf %236, %237 : vector<8x128xf32>
    %239 = vector.extract_strided_slice %227 {offsets = [0, 0], sizes = [8, 128], strides = [1, 1]} : vector<8x256xf32> to vector<8x128xf32>
    %240 = arith.negf %239 : vector<8x128xf32>
    %241 = math.exp %240 : vector<8x128xf32>
    %cst_98 = arith.constant 1.000000e+00 : f32
    %242 = vector.broadcast %cst_98 : f32 to vector<8x128xf32>
    %243 = arith.addf %242, %241 : vector<8x128xf32>
    %244 = arith.divf %242, %243 : vector<8x128xf32>
    %245 = math.tanh %238 : vector<8x128xf32>
    %246 = arith.subf %245, %220 : vector<8x128xf32>
    %247 = arith.mulf %244, %246 : vector<8x128xf32>
    %248 = arith.addf %220, %247 : vector<8x128xf32>
    %c8_i32 = arith.constant 8 : i32
    %c0_99 = arith.constant 0 : index
    %c0_100 = arith.constant 0 : index
    %249 = vector.load %arg9[%c0_99, %c0_100] : memref<8x128xf32, #tpu.memory_space<vmem>>, vector<8x128xf32>
    tpu.vector_store %arg9[%c0_99, %c0_100], %248 {strides = array<i32>} : memref<8x128xf32, #tpu.memory_space<vmem>>, vector<8x128xf32>,
    return
  }
}

</mosaic_0001>

<bundles_post_ra>
// kernel: tpu_custom_call.1
= control target key start
LH: loop header
LB: loop body
LE: loop exit
PB: predicated region body
PF: predicated region fallthrough
CT: control target
= control target key end

     0   :  { %14 = vsyncpa [#allocation4], 0  ;;  %s3884_s0 = inlined_call_operand.hbm [shape: f32[8,8,128], index: 0, kind: input, shape index: {}]   ;;  %s3885_s1 = inlined_call_operand.hbm [shape: f32[8,128], index: 1, kind: input, shape index: {}]   ;;  %s3886_s2 = inlined_call_operand.hbm [shape: f32[128,384], index: 2, kind: input, shape index: {}]   ;;  %s3887_s3 = inlined_call_operand.hbm [shape: f32[128,256], index: 3, kind: input, shape index: {}]   ;;  %s3888_s4 = inlined_call_operand.hbm [shape: f32[128,128], index: 4, kind: input, shape index: {}]   ;;  %s3889_s5 = inlined_call_operand.hbm [shape: f32[128,128], index: 5, kind: input, shape index: {}]   ;;  %s3890_s6 = inlined_call_operand.vmem [shape: f32[1,256], index: 6, kind: input, shape index: {}]   ;;  %s3891_s7 = inlined_call_operand.vmem [shape: f32[1,128], index: 7, kind: input, shape index: {}]   ;;  %s3892_s8 = inlined_call_operand.vmem [shape: f32[1,128], index: 8, kind: input, shape index: {}]   ;;  %s3893_s9 = inlined_call_operand.hbm [shape: f32[8,128], index: 9, kind: output, shape index: {}]  }
   0x1   :  { %15 = vsyncpa [#allocation7], 0 }
   0x2   :  { %16 = vsyncpa [#allocation10], 0 }
   0x3   :  { %17 = vsyncpa [#allocation13], 0 }
   0x4   :  { %18 = vsyncpa [#allocation5], 0  ;;  %s3296_s30 = smov [#allocation6]   ;;  %s3297_s11 = smov [#allocation9]  }
   0x5   :  { %s37_s10 = sshll.u32 %s3296_s30, 4  ;;  %s58_s12 = sshll.u32 %s3297_s11, 4  ;;  %s38_s10 = int_to_ptr.vmem [resolvable:$true] %s37_s10  ;;  %s3362_s12 = int_to_ptr.vmem [resolvable:$true] %s58_s12 }
   0x6   :  { %s3132_s15 = scalar_lea.hbm %s3885_s1, 128 }
   0x7   :  { %p3133_p0 = scmp.ne.s32.totalorder %s3885_s1, %s3132_s15  ;;  %p3136_p1 = scmp.lt.u32.totalorder %s3132_s15, %s3885_s1 }
   0x9   :  { %p3138_p2 = pnand %p3136_p1, %p3133_p0 }
   0xb   :  { %3141 = shalt.err (!%p3138_p2)
}
   0xc   :  { %s3142_s20 = scalar_lea.vmem %s38_s10, 128  ;;  %p3147_p4 = scmp.lt.s32.totalorder %s38_s10, %s38_s10 }
   0xd   :  { %p3143_p3 = scmp.ne.s32.totalorder %s38_s10, %s3142_s20  ;;  %p3148_p5 = scmp.lt.s32.totalorder %s3142_s20, %s3142_s20 }
   0xf   :  { %p3149_p6 = por %p3148_p5, %p3147_p4 }
  0x11   :  { %p3150_p7 = pnand %p3149_p6, %p3143_p3 }
  0x13   :  { %3153 = shalt.err (!%p3150_p7)
}
  0x14   :  { %40 = dma.hbm_to_vmem [thread:$0]  %s3885_s1, 128, %s38_s10, [#allocation7]  }
  0x15   :  { %s3154_s25 = scalar_lea.hbm %s3887_s3, 4096 }
  0x16   :  { %p3155_p8 = scmp.ne.s32.totalorder %s3887_s3, %s3154_s25  ;;  %p3158_p9 = scmp.lt.u32.totalorder %s3154_s25, %s3887_s3 }
  0x18   :  { %p3160_p10 = pnand %p3158_p9, %p3155_p8 }
  0x1a   :  { %3163 = shalt.err (!%p3160_p10)
}
  0x1b   :  { %s3164_s30 = scalar_lea.vmem %s3362_s12, 4096  ;;  %p3169_p12 = scmp.lt.s32.totalorder %s3362_s12, %s3362_s12 }
  0x1c   :  { %p3165_p11 = scmp.ne.s32.totalorder %s3362_s12, %s3164_s30  ;;  %p3170_p13 = scmp.lt.s32.totalorder %s3164_s30, %s3164_s30 }
  0x1e   :  { %p3171_p0 = por %p3170_p13, %p3169_p12 }
  0x20   :  { %p3172_p1 = pnand %p3171_p0, %p3165_p11 }
  0x22   :  { %3175 = shalt.err (!%p3172_p1)
}
  0x23   :  { %s3298_s1 = smov 256   ;;  %s3299_s10 = smov 16  }
  0x24   :  { %64 = dma.hbm_to_vmem [thread:$0]  %s3887_s3, 4096, %s3362_s12, [#allocation10], %s3298_s1, %s3298_s1, %s3299_s10  }
  0x25   :  { %s3300_s14 = smov [#allocation3]   ;;  %s3176_s18 = scalar_lea.hbm %s3884_s0, 1024 }
  0x26   :  { %s24_s15 = sshll.u32 %s3300_s14, 4  ;;  %p3177_p2 = scmp.ne.s32.totalorder %s3884_s0, %s3176_s18  ;;  %s25_s15 = int_to_ptr.vmem [resolvable:$true] %s24_s15 }
  0x27   :  { %p3180_p3 = scmp.lt.u32.totalorder %s3176_s18, %s3884_s0 }
  0x29   :  { %p3182_p4 = pnand %p3180_p3, %p3177_p2 }
  0x2b   :  { %3185 = shalt.err (!%p3182_p4)
}
  0x2c   :  { %s3186_s23 = scalar_lea.vmem %s25_s15, 1024  ;;  %p3191_p6 = scmp.lt.s32.totalorder %s25_s15, %s25_s15 }
  0x2d   :  { %p3187_p5 = scmp.ne.s32.totalorder %s25_s15, %s3186_s23  ;;  %p3192_p7 = scmp.lt.s32.totalorder %s3186_s23, %s3186_s23 }
  0x2f   :  { %p3193_p8 = por %p3192_p7, %p3191_p6 }
  0x31   :  { %p3194_p9 = pnand %p3193_p8, %p3187_p5 }
  0x33   :  { %3197 = shalt.err (!%p3194_p9)
}
  0x34   :  { %s3301_s3 = smov 128   ;;  %s3302_s12 = smov 8  }
  0x35   :  { %30 = dma.hbm_to_vmem [thread:$0]  %s3884_s0, 1024, %s25_s15, [#allocation4], %s3301_s3, %s3301_s3, %s3302_s12  }
  0x36   :  { %s3303_s26 = smov [#allocation8]   ;;  %s3198_s30 = scalar_lea.hbm %s3886_s2, 6144 }
  0x37   :  { %s46_s27 = sshll.u32 %s3303_s26, 4  ;;  %p3199_p10 = scmp.ne.s32.totalorder %s3886_s2, %s3198_s30  ;;  %s47_s27 = int_to_ptr.vmem [resolvable:$true] %s46_s27 }
  0x38   :  { %p3202_p11 = scmp.lt.u32.totalorder %s3198_s30, %s3886_s2 }
  0x3a   :  { %p3204_p12 = pnand %p3202_p11, %p3199_p10 }
  0x3c   :  { %3207 = shalt.err (!%p3204_p12)
}
  0x3d   :  { %s3208_s14 = scalar_lea.vmem %s47_s27, 6144  ;;  %p3213_p0 = scmp.lt.s32.totalorder %s47_s27, %s47_s27 }
  0x3e   :  { %p3209_p13 = scmp.ne.s32.totalorder %s47_s27, %s3208_s14  ;;  %p3214_p1 = scmp.lt.s32.totalorder %s3208_s14, %s3208_s14 }
  0x40   :  { %p3215_p2 = por %p3214_p1, %p3213_p0 }
  0x42   :  { %p3216_p3 = pnand %p3215_p2, %p3209_p13 }
  0x44   :  { %3219 = shalt.err (!%p3216_p3)
}
  0x45   :  { %s3304_s0 = smov 384   ;;  %s3305_s15 = smov 24  }
  0x46   :  { %52 = dma.hbm_to_vmem [thread:$0]  %s3886_s2, 6144, %s47_s27, [#allocation7], %s3304_s0, %s3304_s0, %s3305_s15  }
  0x47   :  { %s3306_s18 = smov [#allocation11]   ;;  %s3307_s20 = smov [#allocation12]  }
  0x48   :  { %s70_s19 = sshll.u32 %s3306_s18, 4  ;;  %s82_s21 = sshll.u32 %s3307_s20, 4  ;;  %s71_s19 = int_to_ptr.vmem [resolvable:$true] %s70_s19  ;;  %s3420_s21 = int_to_ptr.vmem [resolvable:$true] %s82_s21 }
  0x49   :  { %s3220_s24 = scalar_lea.hbm %s3888_s4, 2048 }
  0x4a   :  { %p3221_p4 = scmp.ne.s32.totalorder %s3888_s4, %s3220_s24  ;;  %p3224_p5 = scmp.lt.u32.totalorder %s3220_s24, %s3888_s4 }
  0x4c   :  { %p3226_p6 = pnand %p3224_p5, %p3221_p4 }
  0x4e   :  { %3229 = shalt.err (!%p3226_p6)
}
  0x4f   :  { %s3230_s2 = scalar_lea.vmem %s71_s19, 2048  ;;  %p3235_p8 = scmp.lt.s32.totalorder %s71_s19, %s71_s19 }
  0x50   :  { %p3231_p7 = scmp.ne.s32.totalorder %s71_s19, %s3230_s2  ;;  %p3236_p9 = scmp.lt.s32.totalorder %s3230_s2, %s3230_s2 }
  0x52   :  { %p3237_p10 = por %p3236_p9, %p3235_p8 }
  0x54   :  { %p3238_p11 = pnand %p3237_p10, %p3231_p7 }
  0x56   :  { %3241 = shalt.err (!%p3238_p11)
}
  0x57   :  { %76 = dma.hbm_to_vmem [thread:$0]  %s3888_s4, 2048, %s71_s19, [#allocation10], %s3301_s3, %s3301_s3, %s3302_s12  }
  0x58   :  { %s3242_s11 = scalar_lea.hbm %s3889_s5, 2048 }
  0x59   :  { %p3243_p12 = scmp.ne.s32.totalorder %s3889_s5, %s3242_s11  ;;  %p3246_p13 = scmp.lt.u32.totalorder %s3242_s11, %s3889_s5 }
  0x5b   :  { %p3248_p0 = pnand %p3246_p13, %p3243_p12 }
  0x5d   :  { %3251 = shalt.err (!%p3248_p0)
}
  0x5e   :  { %s3252_s16 = scalar_lea.vmem %s3420_s21, 2048  ;;  %p3257_p2 = scmp.lt.s32.totalorder %s3420_s21, %s3420_s21 }
  0x5f   :  { %p3253_p1 = scmp.ne.s32.totalorder %s3420_s21, %s3252_s16  ;;  %p3258_p3 = scmp.lt.s32.totalorder %s3252_s16, %s3252_s16 }
  0x61   :  { %p3259_p4 = por %p3258_p3, %p3257_p2 }
  0x63   :  { %p3260_p5 = pnand %p3259_p4, %p3253_p1 }
  0x65   :  { %3263 = shalt.err (!%p3260_p5)
}
  0x66   :  { %88 = dma.hbm_to_vmem [thread:$0]  %s3889_s5, 2048, %s3420_s21, [#allocation13], %s3301_s3, %s3301_s3, %s3302_s12  }
  0x67   :  { %3286 = dma.done.wait [#allocation4], 1024  }
  0x68   :  { %3287 = vsyncadd [#allocation4], 4294966272 }
  0x69   :  { %3288 = dma.done.wait [#allocation7], 6272  }
  0x6a   :  { %3289 = vsyncadd [#allocation7], 4294961024 }
  0x6b   :  { %3290 = dma.done.wait [#allocation10], 6144  }
  0x6c   :  { %3291 = vsyncadd [#allocation10], 4294961152 }
  0x6d   :  { %3292 = dma.done.wait [#allocation13], 2048  }
  0x6e   :  { %3293 = vsyncadd [#allocation13], 4294965248  ;;  %v3308_v0 = vmov 0.0|0.0   ;;  %vm3309_vm0 = vmmov 0   ;;  %v3310_v1 = vmov 0.0   ;;  %v114_v2 = vld [vmem:[#allocation12] sm:$0xff] }
  0x6f   :  { %2468 = vmatprep.subr.bf16.mxu0 %v3308_v0  ;;  %2141 = vmatprep.mubr.msk.f32.mxu0 %vm3309_vm0, %v3310_v1  ;;  %v115_v3 = vld [vmem:[#allocation12 + $0x8] sm:$0xff]  ;;  %v220_v6 = vld [vmem:[#allocation8 + $0x20] sm:$0xff]  ;;  %v219_v8 = vld [vmem:[#allocation8 + $0x18] sm:$0xff] }
  0x70   :  { %328 = vmatprep.mubr.f32.mxu1 %v3310_v1  ;;  %v217_v4 = vld [vmem:[#allocation8 + $0x8] sm:$0xff]  ;;  %v2469_v5 = vpack.c.bf16 %v115_v3, %v114_v2  ;;  %v216_v7 = vld [vmem:[#allocation8] sm:$0xff]  ;;  %v116_v11 = vld [vmem:[#allocation12 + $0x10] sm:$0xff] }
  0x71   :  { %v2492_v9 = vpack.c.bf16 %v220_v6, %v217_v4  ;;  %v2494_v10 = vpack.c.bf16 %v219_v8, %v216_v7  ;;  %v117_v12 = vld [vmem:[#allocation12 + $0x18] sm:$0xff]  ;;  %v226_v15 = vld [vmem:[#allocation8 + $0x50] sm:$0xff]  ;;  %v225_v17 = vld [vmem:[#allocation8 + $0x48] sm:$0xff] }
  0x72   :  { %v223_v13 = vld [vmem:[#allocation8 + $0x38] sm:$0xff]  ;;  %2470 = vmatpush3.bf16.msra.mxu0 %v2469_v5  ;;  %v2472_v14 = vpack.c.bf16 %v117_v12, %v116_v11  ;;  %v222_v16 = vld [vmem:[#allocation8 + $0x30] sm:$0xff]  ;;  %v118_v19 = vld [vmem:[#allocation12 + $0x20] sm:$0xff] }
  0x73   :  { %2493 = vmatprep.subr.bf16.mxu1 %v2492_v9  ;;  %2471 = vmatprep.subr.bf16.mxu0 %v3308_v0  ;;  %v2496_v18 = vpack.c.bf16 %v226_v15, %v223_v13  ;;  %v119_v20 = vld [vmem:[#allocation12 + $0x28] sm:$0xff]  ;;  %v2498_v22 = vpack.c.bf16 %v225_v17, %v222_v16  ;;  %v232_v23 = vld [vmem:[#allocation8 + $0x80] sm:$0xff]  ;;  %v231_v26 = vld [vmem:[#allocation8 + $0x78] sm:$0xff] }
  0x74   :  { %v229_v21 = vld [vmem:[#allocation8 + $0x68] sm:$0xff]  ;;  %2495 = vmatpush1.bf16.msra.mxu1 %v2494_v10  ;;  %v228_v25 = vld [vmem:[#allocation8 + $0x60] sm:$0xff]  ;;  %v2475_v27 = vpack.c.bf16 %v119_v20, %v118_v19  ;;  %v235_v28 = vld [vmem:[#allocation8 + $0x98] sm:$0xff] }
  0x75   :  { %2497 = vmatprep.subr.bf16.mxu1 %v2496_v18  ;;  %v2500_v24 = vpack.c.bf16 %v232_v23, %v229_v21  ;;  %v238_v29 = vld [vmem:[#allocation8 + $0xb0] sm:$0xff]  ;;  %v121_v31 = vld [vmem:[#allocation12 + $0x38] sm:$0xff]  ;;  %v2502_v32 = vpack.c.bf16 %v231_v26, %v228_v25  ;;  %v237_v35 = vld [vmem:[#allocation8 + $0xa8] sm:$0xff] }
  0x76   :  { %2473 = vmatpush3.bf16.msra.mxu0 %v2472_v14  ;;  %v120_v30 = vld [vmem:[#allocation12 + $0x30] sm:$0xff]  ;;  %v2504_v33 = vpack.c.bf16 %v238_v29, %v235_v28  ;;  %v241_v37 = vld [vmem:[#allocation8 + $0xc8] sm:$0xff]  ;;  %v244_v38 = vld [vmem:[#allocation8 + $0xe0] sm:$0xff] }
  0x77   :  { %2474 = vmatprep.subr.bf16.mxu0 %v3308_v0  ;;  %v234_v34 = vld [vmem:[#allocation8 + $0x90] sm:$0xff]  ;;  %v2478_v36 = vpack.c.bf16 %v121_v31, %v120_v30  ;;  %v122_v39 = vld [vmem:[#allocation12 + $0x40] sm:$0xff]  ;;  %v123_v40 = vld [vmem:[#allocation12 + $0x48] sm:$0xff]  ;;  %v2508_v42 = vpack.c.bf16 %v244_v38, %v241_v37 }
  0x78   :  { %2499 = vmatpush1.bf16.msra.mxu1 %v2498_v22  ;;  %v2506_v41 = vpack.c.bf16 %v237_v35, %v234_v34  ;;  %v240_v43 = vld [vmem:[#allocation8 + $0xc0] sm:$0xff]  ;;  %v243_v44 = vld [vmem:[#allocation8 + $0xd8] sm:$0xff]  ;;  %v2481_v45 = vpack.c.bf16 %v123_v40, %v122_v39  ;;  %v250_v47 = vld [vmem:[#allocation8 + $0x110] sm:$0xff] }
  0x79   :  { %2501 = vmatprep.subr.bf16.mxu1 %v2500_v24  ;;  %v247_v46 = vld [vmem:[#allocation8 + $0xf8] sm:$0xff]  ;;  %v124_v48 = vld [vmem:[#allocation12 + $0x50] sm:$0xff]  ;;  %v2510_v50 = vpack.c.bf16 %v243_v44, %v240_v43  ;;  %v249_v53 = vld [vmem:[#allocation8 + $0x108] sm:$0xff] }
  0x7a   :  { %2476 = vmatpush3.bf16.msra.mxu0 %v2475_v27  ;;  %v125_v49 = vld [vmem:[#allocation12 + $0x58] sm:$0xff]  ;;  %v2512_v51 = vpack.c.bf16 %v250_v47, %v247_v46  ;;  %v246_v52 = vld [vmem:[#allocation8 + $0xf0] sm:$0xff]  ;;  %v253_v55 = vld [vmem:[#allocation8 + $0x128] sm:$0xff] }
  0x7b   :  { %2477 = vmatprep.subr.bf16.mxu0 %v3308_v0  ;;  %v2484_v54 = vpack.c.bf16 %v125_v49, %v124_v48  ;;  %v256_v56 = vld [vmem:[#allocation8 + $0x140] sm:$0xff]  ;;  %v127_v58 = vld [vmem:[#allocation12 + $0x68] sm:$0xff]  ;;  %v2514_v59 = vpack.c.bf16 %v249_v53, %v246_v52  ;;  %v255_v62 = vld [vmem:[#allocation8 + $0x138] sm:$0xff] }
  0x7c   :  { %2503 = vmatpush1.bf16.msra.mxu1 %v2502_v32  ;;  %v126_v57 = vld [vmem:[#allocation12 + $0x60] sm:$0xff]  ;;  %v2516_v60 = vpack.c.bf16 %v256_v56, %v253_v55  ;;  %v259_v2 = vld [vmem:[#allocation8 + $0x158] sm:$0xff]  ;;  %v262_v3 = vld [vmem:[#allocation8 + $0x170] sm:$0xff] }
  0x7d   :  { %2505 = vmatprep.subr.bf16.mxu1 %v2504_v33  ;;  %v252_v61 = vld [vmem:[#allocation8 + $0x120] sm:$0xff]  ;;  %v2487_v63 = vpack.c.bf16 %v127_v58, %v126_v57  ;;  %v128_v4 = vld [vmem:[#allocation12 + $0x70] sm:$0xff]  ;;  %v129_v5 = vld [vmem:[#allocation12 + $0x78] sm:$0xff]  ;;  %v2520_v9 = vpack.c.bf16 %v262_v3, %v259_v2 }
  0x7e   :  { %2479 = vmatpush3.bf16.msra.mxu0 %v2478_v36  ;;  %v2518_v6 = vpack.c.bf16 %v255_v62, %v252_v61  ;;  %v218_v7 = vld [vmem:[#allocation8 + $0x10] sm:$0xff]  ;;  %v221_v8 = vld [vmem:[#allocation8 + $0x28] sm:$0xff]  ;;  %v2490_v12 = vpack.c.bf16 %v129_v5, %v128_v4  ;;  %v558_v14 = vld [vmem:[#allocation9 + $0x18] sm:$0xff] }
  0x7f   :  { %2480 = vmatprep.subr.bf16.mxu0 %v3308_v0  ;;  %v258_v10 = vld [vmem:[#allocation8 + $0x150] sm:$0xff]  ;;  %v261_v11 = vld [vmem:[#allocation8 + $0x168] sm:$0xff]  ;;  %v2524_v15 = vpack.c.bf16 %v221_v8, %v218_v7  ;;  %v224_v17 = vld [vmem:[#allocation8 + $0x40] sm:$0xff] }
  0x80   :  { %2507 = vmatpush1.bf16.msra.mxu1 %v2506_v41  ;;  %v556_v13 = vld [vmem:[#allocation9 + $0x8] sm:$0xff]  ;;  %v2522_v16 = vpack.c.bf16 %v261_v11, %v258_v10  ;;  %v227_v18 = vld [vmem:[#allocation8 + $0x58] sm:$0xff]  ;;  %v555_v20 = vld [vmem:[#allocation9] sm:$0xff] }
  0x81   :  { %2509 = vmatprep.subr.bf16.mxu1 %v2508_v42  ;;  %v3468_v19 = vpack.c.bf16 %v558_v14, %v556_v13  ;;  %v557_v21 = vld [vmem:[#allocation9 + $0x10] sm:$0xff]  ;;  %v3470_v22 = vld [vmem:[#allocation6] sm:$0xff]  ;;  %v560_v23 = vld [vmem:[#allocation9 + $0x28] sm:$0xff]  ;;  %v2528_v25 = vpack.c.bf16 %v227_v18, %v224_v17 }
  0x82   :  { %2482 = vmatpush3.bf16.msra.mxu0 %v2481_v45  ;;  %v562_v24 = vld [vmem:[#allocation9 + $0x38] sm:$0xff]  ;;  %v3472_v27 = vpack.c.bf16 %v557_v21, %v555_v20  ;;  %v230_v28 = vld [vmem:[#allocation8 + $0x70] sm:$0xff]  ;;  %v233_v29 = vld [vmem:[#allocation8 + $0x88] sm:$0xff] }
  0x83   :  { %2483 = vmatprep.subr.bf16.mxu0 %v3308_v0  ;;  %v208_v26 = vld [vmem:[#allocation3] sm:$0xff]  ;;  %v3476_v30 = vpack.c.bf16 %v562_v24, %v560_v23  ;;  %v559_v31 = vld [vmem:[#allocation9 + $0x20] sm:$0xff]  ;;  %v561_v32 = vld [vmem:[#allocation9 + $0x30] sm:$0xff]  ;;  %v2532_v35 = vpack.c.bf16 %v233_v29, %v230_v28 }
  0x84   :  { %2511 = vmatpush1.bf16.msra.mxu1 %v2510_v50  ;;  %v564_v33 = vld [vmem:[#allocation9 + $0x48] sm:$0xff]  ;;  %v566_v34 = vld [vmem:[#allocation9 + $0x58] sm:$0xff]  ;;  %v3480_v36 = vld [vmem:[#allocation3 + $0x8] sm:$0xff]  ;;  %v3482_v37 = vpack.c.bf16 %v561_v32, %v559_v31 }
  0x85   :  { %2513 = vmatprep.subr.bf16.mxu1 %v2512_v51  ;;  %v236_v38 = vld [vmem:[#allocation8 + $0xa0] sm:$0xff]  ;;  %v239_v39 = vld [vmem:[#allocation8 + $0xb8] sm:$0xff]  ;;  %v3485_v40 = vpack.c.bf16 %v566_v34, %v564_v33  ;;  %v565_v42 = vld [vmem:[#allocation9 + $0x50] sm:$0xff] }
  0x86   :  { %2485 = vmatpush3.bf16.msra.mxu0 %v2484_v54  ;;  %v563_v41 = vld [vmem:[#allocation9 + $0x40] sm:$0xff]  ;;  %v568_v43 = vld [vmem:[#allocation9 + $0x68] sm:$0xff]  ;;  %v570_v44 = vld [vmem:[#allocation9 + $0x78] sm:$0xff]  ;;  %v2536_v45 = vpack.c.bf16 %v239_v39, %v236_v38 }
  0x87   :  { %2486 = vmatprep.subr.bf16.mxu0 %v3308_v0  ;;  %v3490_v46 = vld [vmem:[#allocation3 + $0x10] sm:$0xff]  ;;  %v3492_v47 = vpack.c.bf16 %v565_v42, %v563_v41  ;;  %v242_v48 = vld [vmem:[#allocation8 + $0xd0] sm:$0xff]  ;;  %v3495_v50 = vpack.c.bf16 %v570_v44, %v568_v43  ;;  %v567_v51 = vld [vmem:[#allocation9 + $0x60] sm:$0xff] }
  0x88   :  { %2515 = vmatpush1.bf16.msra.mxu1 %v2514_v59  ;;  %v245_v49 = vld [vmem:[#allocation8 + $0xe8] sm:$0xff]  ;;  %v569_v52 = vld [vmem:[#allocation9 + $0x70] sm:$0xff]  ;;  %v574_v54 = vld [vmem:[#allocation9 + $0x98] sm:$0xff] }
  0x89   :  { %2517 = vmatprep.subr.bf16.mxu1 %v2516_v60  ;;  %v572_v53 = vld [vmem:[#allocation9 + $0x88] sm:$0xff]  ;;  %v2540_v55 = vpack.c.bf16 %v245_v49, %v242_v48  ;;  %v3500_v56 = vld [vmem:[#allocation3 + $0x18] sm:$0xff]  ;;  %v3502_v57 = vpack.c.bf16 %v569_v52, %v567_v51  ;;  %v248_v58 = vld [vmem:[#allocation8 + $0x100] sm:$0xff] }
  0x8a   :  { %2488 = vmatpush3.bf16.msra.mxu0 %v2487_v63  ;;  %v251_v59 = vld [vmem:[#allocation8 + $0x118] sm:$0xff]  ;;  %v3505_v60 = vpack.c.bf16 %v574_v54, %v572_v53  ;;  %v571_v61 = vld [vmem:[#allocation9 + $0x80] sm:$0xff]  ;;  %v573_v62 = vld [vmem:[#allocation9 + $0x90] sm:$0xff] }
  0x8b   :  { %2489 = vmatprep.subr.bf16.mxu0 %v3308_v0  ;;  %v576_v63 = vld [vmem:[#allocation9 + $0xa8] sm:$0xff]  ;;  %v578_v2 = vld [vmem:[#allocation9 + $0xb8] sm:$0xff]  ;;  %v2544_v3 = vpack.c.bf16 %v251_v59, %v248_v58  ;;  %v3510_v5 = vpack.c.bf16 %v573_v62, %v571_v61  ;;  %v577_v10 = vld [vmem:[#allocation9 + $0xb0] sm:$0xff] }
  0x8c   :  { %2519 = vmatpush1.bf16.msra.mxu1 %v2518_v6  ;;  %v212_v4 = vld [vmem:[#allocation3 + $0x20] sm:$0xff]  ;;  %v254_v6 = vld [vmem:[#allocation8 + $0x130] sm:$0xff]  ;;  %v257_v7 = vld [vmem:[#allocation8 + $0x148] sm:$0xff]  ;;  %v3513_v8 = vpack.c.bf16 %v578_v2, %v576_v63 }
  0x8d   :  { %2521 = vmatprep.subr.bf16.mxu1 %v2520_v9  ;;  %v575_v9 = vld [vmem:[#allocation9 + $0xa0] sm:$0xff]  ;;  %v580_v11 = vld [vmem:[#allocation9 + $0xc8] sm:$0xff]  ;;  %v2548_v13 = vpack.c.bf16 %v257_v7, %v254_v6  ;;  %v263_v17 = vld [vmem:[#allocation8 + $0x178] sm:$0xff] }
  0x8e   :  { %2491 = vmatpush3.bf16.msra.mxu0 %v2490_v12  ;;  %v582_v12 = vld [vmem:[#allocation9 + $0xd8] sm:$0xff]  ;;  %v213_v14 = vld [vmem:[#allocation3 + $0x28] sm:$0xff]  ;;  %v581_v21 = vld [vmem:[#allocation9 + $0xd0] sm:$0xff] }
  0x8f   :  { %2525 = vmatprep.subr.bf16.mxu0 %v2524_v15  ;;  %v3520_v18 = vpack.c.bf16 %v582_v12, %v580_v11  ;;  %v579_v20 = vld [vmem:[#allocation9 + $0xc0] sm:$0xff]  ;;  %v584_v23 = vld [vmem:[#allocation9 + $0xe8] sm:$0xff]  ;;  %v586_v24 = vld [vmem:[#allocation9 + $0xf8] sm:$0xff] }
  0x90   :  { %2523 = vmatpush1.bf16.msra.mxu1 %v2522_v16  ;;  %v260_v16 = vld [vmem:[#allocation8 + $0x160] sm:$0xff]  ;;  %v3524_v28 = vpack.c.bf16 %v581_v21, %v579_v20  ;;  %v3527_v29 = vpack.c.bf16 %v586_v24, %v584_v23  ;;  %v585_v32 = vld [vmem:[#allocation9 + $0xf0] sm:$0xff]  ;;  %v482_v38 = vld [vmem:[%s3890_s6] sm:$0x3] }
  0x91   :  { %2142 = vmatmul.mubr.f32.vlgmr.msra.gmra.mrb[0].mxu0 %v3470_v22  ;;  %2557 = vmatprep.subr.bf16.mxu1 %v3468_v19  ;;  %v583_v31 = vld [vmem:[#allocation9 + $0xe0] sm:$0xff]  ;;  %v215_v33 = vld [vmem:[#allocation3 + $0x38] sm:$0xff]  ;;  %v666_v43 = vld [vmem:[#allocation11 + $0x8] sm:$0xff] }
  0x92   :  { %2527 = vmatpush3.bf16.msra.mxu0 %v2524_v15  ;;  %2176 = vmatprep.mubr.f32.mxu0 %v208_v26  ;;  %v3517_v15 = vpack.c.bf16 %v577_v10, %v575_v9  ;;  %v3531_v34 = vpack.c.bf16 %v585_v32, %v583_v31  ;;  %v665_v42 = vld [vmem:[#allocation11] sm:$0xff]  ;;  %v670_v51 = vld [vmem:[#allocation11 + $0x28] sm:$0xff]  ;;  %v671_v53 = vld [vmem:[#allocation11 + $0x30] sm:$0xff] }
  0x93   :  { %329 = vmatmul.mubr.f32.vlgmr.msra.gmra.mrb[0].mxu1 %v208_v26  ;;  %2529 = vmatprep.subr.bf16.mxu0 %v2528_v25  ;;  %v214_v26 = vld [vmem:[#allocation3 + $0x30] sm:$0xff]  ;;  %v3564_v44 = vpack.c.bf16 %v666_v43, %v665_v42  ;;  %v669_v49 = vld [vmem:[#allocation11 + $0x20] sm:$0xff]  ;;  %v672_v54 = vld [vmem:[#allocation11 + $0x38] sm:$0xff] }
  0x94   :  { %2559 = vmatpush1.bf16.msra.mxu1 %v3472_v27  ;;  %334 = vmatprep.mubr.f32.mxu1 %v3310_v1  ;;  %v3572_v52 = vpack.c.bf16 %v670_v51, %v669_v49  ;;  %v674_v58 = vld [vmem:[#allocation11 + $0x48] sm:$0xff]  ;;  %v675_v61 = vld [vmem:[#allocation11 + $0x50] sm:$0xff]  ;;  %v676_v62 = vld [vmem:[#allocation11 + $0x58] sm:$0xff] }
  0x95   :  { %2561 = vmatprep.subr.bf16.mxu1 %v3476_v30  ;;  %v3584_v63 = vpack.c.bf16 %v676_v62, %v675_v61  ;;  %v677_v2 = vld [vmem:[#allocation11 + $0x60] sm:$0xff]  ;;  %v679_v6 = vld [vmem:[#allocation11 + $0x70] sm:$0xff]  ;;  %v680_v7 = vld [vmem:[#allocation11 + $0x78] sm:$0xff] }
  0x96   :  { %2531 = vmatpush3.bf16.msra.mxu0 %v2528_v25  ;;  %v2552_v25 = vpack.c.bf16 %v263_v17, %v260_v16  ;;  %v3591_v9 = vpack.c.bf16 %v680_v7, %v679_v6  ;;  %v1914_v10 = vld [vmem:[%s3892_s8] ss:$0 sm:$0xff] }
  0x97   :  { %335 = vmatmul.mubr.f32.gmra.mrb[2].mxu1 %v3480_v36  ;;  %2533 = vmatprep.subr.bf16.mxu0 %v2532_v35  ;;  %v1915_v20 = vld [vmem:[%s3891_s7] ss:$0 sm:$0xff]  ;;  %s3311_s7 = smov [#allocation14]  }
  0x98   :  { %2563 = vmatpush1.bf16.msra.mxu1 %v3482_v37  ;;  %340 = vmatprep.mubr.f32.mxu1 %v3310_v1  ;;  %s1902_s8 = sshll.u32 %s3311_s7, 4  ;;  %s1903_s8 = int_to_ptr.vmem [resolvable:$true] %s1902_s8 }
  0x99   :  { %2565 = vmatprep.subr.bf16.mxu1 %v3485_v40  ;;  %s3264_s20 = scalar_lea.vmem %s1903_s8, 128  ;;  %p3269_p7 = scmp.lt.s32.totalorder %s1903_s8, %s1903_s8 }
  0x9a   :  { %2535 = vmatpush3.bf16.msra.mxu0 %v2532_v35  ;;  %v484_v35 = vlaneseq  ;;  %p3265_p6 = scmp.ne.s32.totalorder %s1903_s8, %s3264_s20  ;;  %p3270_p8 = scmp.lt.s32.totalorder %s3264_s20, %s3264_s20 }
  0x9b   :  { %341 = vmatmul.mubr.f32.gmra.mrb[4].mxu1 %v3490_v46  ;;  %2537 = vmatprep.subr.bf16.mxu0 %v2536_v45 }
  0x9c   :  { %2567 = vmatpush1.bf16.msra.mxu1 %v3492_v47  ;;  %346 = vmatprep.mubr.f32.mxu1 %v3310_v1  ;;  %p3271_p9 = por %p3270_p8, %p3269_p7 }
  0x9d   :  { %2569 = vmatprep.subr.bf16.mxu1 %v3495_v50 }
  0x9e   :  { %2539 = vmatpush3.bf16.msra.mxu0 %v2536_v45  ;;  %v667_v45 = vld [vmem:[#allocation11 + $0x10] sm:$0xff]  ;;  %p3272_p10 = pnand %p3271_p9, %p3265_p6 }
  0x9f   :  { %347 = vmatmul.mubr.f32.gmra.mrb[6].mxu1 %v3500_v56  ;;  %2541 = vmatprep.subr.bf16.mxu0 %v2540_v55 }
  0xa0   :  { %2571 = vmatpush1.bf16.msra.mxu1 %v3502_v57  ;;  %352 = vmatprep.mubr.f32.mxu1 %v3310_v1 }
  0xa1   :  { %2573 = vmatprep.subr.bf16.mxu1 %v3505_v60 }
  0xa2   :  { %2543 = vmatpush3.bf16.msra.mxu0 %v2540_v55  ;;  %v3576_v55 = vpack.c.bf16 %v672_v54, %v671_v53 }
  0xa3   :  { %353 = vmatmul.mubr.f32.gmra.mrb[8].mxu1 %v212_v4  ;;  %2545 = vmatprep.subr.bf16.mxu0 %v2544_v3 }
  0xa4   :  { %2575 = vmatpush1.bf16.msra.mxu1 %v3510_v5  ;;  %358 = vmatprep.mubr.f32.mxu1 %v3310_v1 }
  0xa5   :  { %2577 = vmatprep.subr.bf16.mxu1 %v3513_v8 }
  0xa6   :  { %2547 = vmatpush3.bf16.msra.mxu0 %v2544_v3  ;;  %v678_v3 = vld [vmem:[#allocation11 + $0x68] sm:$0xff] }
  0xa7   :  { %359 = vmatmul.mubr.f32.gmra.mrb[10].mxu1 %v213_v14  ;;  %2549 = vmatprep.subr.bf16.mxu0 %v2548_v13 }
  0xa8   :  { %2579 = vmatpush1.bf16.msra.mxu1 %v3517_v15  ;;  %364 = vmatprep.mubr.f32.mxu1 %v3310_v1 }
  0xa9   :  { %2581 = vmatprep.subr.bf16.mxu1 %v3520_v18 }
  0xaa   :  { %2551 = vmatpush3.bf16.msra.mxu0 %v2548_v13 }
  0xab   :  { %365 = vmatmul.mubr.f32.gmra.mrb[12].mxu1 %v214_v26  ;;  %2553 = vmatprep.subr.bf16.mxu0 %v2552_v25 }
  0xac   :  { %2583 = vmatpush1.bf16.msra.mxu1 %v3524_v28  ;;  %370 = vmatprep.mubr.f32.mxu1 %v3310_v1 }
  0xad   :  { %2585 = vmatprep.subr.bf16.mxu1 %v3527_v29 }
  0xae   :  { %2555 = vmatpush3.bf16.msra.mxu0 %v2552_v25 }
  0xaf   :  { %371 = vmatmul.mubr.f32.gmra.mrb[14].mxu1 %v215_v33  ;;  %2588 = vmatprep.subr.bf16.mxu0 %v3308_v0 }
  0xb0   :  { %2587 = vmatpush1.bf16.msra.mxu1 %v3531_v34  ;;  %651 = vmatprep.mubr.f32.mxu1 %v3310_v1 }
  0xb1   :  { %2177 = vmatmul.mubr.f32.vlgmr.msra.gmra.mrb[2].mxu0 %v3480_v36  ;;  %2613 = vmatprep.subr.bf16.mxu1 %v3468_v19  ;;  %v485_v36 = vshrl.u32 %v484_v35, 7 }
  0xb2   :  { %2179 = vmatprep.mubr.f32.mxu0 %v3490_v46  ;;  %2590 = vmatpush3.bf16.msra.mxu0 %v3564_v44  ;;  %v668_v46 = vld [vmem:[#allocation11 + $0x18] sm:$0xff] }
  0xb3   :  { %652 = vmatmul.mubr.f32.vlgmr.msra.gmra.mrb[0].mxu1 %v3470_v22  ;;  %v486_v39 = vsub.s32 0, %v485_v36  ;;  %2591 = vmatprep.subr.bf16.mxu0 %v3308_v0  ;;  %v3568_v48 = vpack.c.bf16 %v668_v46, %v667_v45  ;;  %v490_v17 = vsub.s32 1, %v485_v36 }
  0xb4   :  { %2615 = vmatpush1.bf16.msra.mxu1 %v3472_v27  ;;  %829 = vmatprep.mubr.f32.mxu1 %v3310_v1 }
  0xb5   :  { %2180 = vmatmul.mubr.f32.gmra.mrb[4].mxu0 %v3500_v56  ;;  %2617 = vmatprep.subr.bf16.mxu1 %v3476_v30  ;;  %v487_v41 = vrot.slane %v482_v38, %v486_v39  ;;  %v673_v56 = vld [vmem:[#allocation11 + $0x40] sm:$0xff]  ;;  %v491_v21 = vrot.slane %v482_v38, %v490_v17 }
  0xb6   :  { %2182 = vmatprep.mubr.f32.mxu0 %v212_v4  ;;  %2593 = vmatpush3.bf16.msra.mxu0 %v3568_v48  ;;  %v3580_v59 = vpack.c.bf16 %v674_v58, %v673_v56  ;;  %v3587_v4 = vpack.c.bf16 %v678_v3, %v677_v2 }
  0xb7   :  { %2594 = vmatprep.subr.bf16.mxu0 %v3308_v0 }
  0xb8   :  { %2619 = vmatpush1.bf16.msra.mxu1 %v3482_v37 }
  0xb9   :  { %2183 = vmatmul.mubr.f32.gmra.mrb[6].mxu0 %v213_v14  ;;  %2621 = vmatprep.subr.bf16.mxu1 %v3485_v40 }
  0xba   :  { %2185 = vmatprep.mubr.f32.mxu0 %v214_v26  ;;  %2596 = vmatpush3.bf16.msra.mxu0 %v3572_v52 }
  0xbb   :  { %2597 = vmatprep.subr.bf16.mxu0 %v3308_v0 }
  0xbc   :  { %2623 = vmatpush1.bf16.msra.mxu1 %v3492_v47 }
  0xbd   :  { %2186 = vmatmul.mubr.f32.gmra.mrb[8].mxu0 %v215_v33  ;;  %2625 = vmatprep.subr.bf16.mxu1 %v3495_v50 }
  0xbe   :  { %2220 = vmatprep.mubr.msk.f32.mxu0 %vm3309_vm0, %v3310_v1  ;;  %2599 = vmatpush3.bf16.msra.mxu0 %v3576_v55 }
  0xbf   :  { %2600 = vmatprep.subr.bf16.mxu0 %v3308_v0 }
  0xc0   :  { %2627 = vmatpush1.bf16.msra.mxu1 %v3502_v57 }
  0xc1   :  { %2629 = vmatprep.subr.bf16.mxu1 %v3505_v60 }
  0xc2   :  { %2602 = vmatpush3.bf16.msra.mxu0 %v3580_v59 }
  0xc3   :  { %2603 = vmatprep.subr.bf16.mxu0 %v3308_v0 }
  0xc4   :  { %2631 = vmatpush1.bf16.msra.mxu1 %v3510_v5 }
  0xc5   :  { %2633 = vmatprep.subr.bf16.mxu1 %v3513_v8 }
  0xc6   :  { %2605 = vmatpush3.bf16.msra.mxu0 %v3584_v63 }
  0xc7   :  { %2606 = vmatprep.subr.bf16.mxu0 %v3308_v0 }
  0xc8   :  { %2635 = vmatpush1.bf16.msra.mxu1 %v3517_v15 }
  0xc9   :  { %2637 = vmatprep.subr.bf16.mxu1 %v3520_v18 }
  0xca   :  { %2608 = vmatpush3.bf16.msra.mxu0 %v3587_v4 }
  0xcb   :  { %2609 = vmatprep.subr.bf16.mxu0 %v3308_v0 }
  0xcc   :  { %2639 = vmatpush1.bf16.msra.mxu1 %v3524_v28 }
  0xcd   :  { %2641 = vmatprep.subr.bf16.mxu1 %v3527_v29 }
  0xce   :  { %2611 = vmatpush3.bf16.msra.mxu0 %v3591_v9 }
  0xcf   :  { %2644 = vmatprep.subr.bf16.mxu0 %v3308_v0 }
  0xd0   :  { %2643 = vmatpush1.bf16.msra.mxu1 %v3531_v34 }
  0xd1   :  { %2669 = vmatprep.subr.bf16.mxu1 %v3468_v19 }
 0x164   :  { %v203_v11 = vpop.f32.mrb[0].mxu0 }
 0x165   :  { %v204_v12 = vadd.f32 %v1914_v10, %v203_v11  ;;  %v2143_v13 = vpop.f32.mrb[1].mxu0 }
 0x167   :  { %v207_v14 = vmax.f32 %v204_v12, 0.0 }
 0x169   :  { %v3599_v16 = vadd.f32 %v487_v41, %v207_v14  ;;  %v503_v23 = vadd.f32 %v1915_v20, %v207_v14  ;;  %v3604_v24 = vadd.f32 %v491_v21, %v207_v14 }
 0x184   :  { %v2178_v25 = vpop.f32.mrb[2].mxu0 }
 0x185   :  { %v3606_v26 = vadd.f32 %v2178_v25, %v503_v23  ;;  %v443_v31 = vpop.f32.mrb[3].mxu0 }
 0x186   :  { %v653_v32 = vpop.f32.mrb[0].mxu1  ;;  %v506_v33 = vadd.f32 %v503_v23, %v443_v31 }
 0x187   :  { %v655_v35 = vpop.f32.mrb[1].mxu1  ;;  %v3004_v6 = vadd.f32 %v653_v32, %v3599_v16 }
 0x188   :  { %v3005_v39 = vadd.f32 %v655_v35, %v3604_v24  ;;  %v2181_v41 = vpop.f32.mrb[4].mxu0 }
 0x189   :  { %v3609_v42 = vadd.f32 %v2181_v41, %v503_v23  ;;  %v453_v36 = vpop.f32.mrb[5].mxu0  ;;  %v1917_v7 = vmul.f32 -1.442695, %v3004_v6 }
 0x18a   :  { %v1916_v43 = vmul.f32 -1.442695, %v3005_v39  ;;  %v3611_v45 = vadd.f32 %v503_v23, %v453_v36 }
 0x18c   :  { %3052 = vpow2.f32 %v1916_v43  ;;  %v2184_v38 = vpop.f32.mrb[6].mxu0 }
 0x18d   :  { %v3613_v46 = vadd.f32 %v2184_v38, %v503_v23  ;;  %v463_v49 = vpop.f32.mrb[7].mxu0 }
 0x18e   :  { %v3615_v51 = vadd.f32 %v503_v23, %v463_v49 }
 0x190   :  { %v2187_v53 = vpop.f32.mrb[8].mxu0 }
 0x191   :  { %v3617_v54 = vadd.f32 %v2187_v53, %v503_v23  ;;  %v473_v56 = vpop.f32.mrb[9].mxu0 }
 0x192   :  { %v3619_v58 = vadd.f32 %v503_v23, %v473_v56 }
 0x196   :  { %v3053_v61 = vpop.eup %3052 }
 0x197   :  { %v661_v62 = vadd.f32 1.0, %v3053_v61 }
 0x199   :  { %3054 = vrcp.f32 %v661_v62 }
 0x19a   :  { %3056 = vpow2.f32 %v1917_v7 }
 0x1a3   :  { %v3055_v2 = vpop.eup %3054 }
 0x1a4   :  { %v664_v3 = vmul.f32 %v3055_v2, %v3470_v22  ;;  %v3057_v10 = vpop.eup %3056 }
 0x1a5   :  { %v754_v12 = vadd.f32 1.0, %v3057_v10 }
 0x1a6   :  { %2221 = vmatmul.mubr.f32.vlgmr.msra.gmra.mrb[10].mxu0 %v664_v3 }
 0x1a7   :  { %2646 = vmatpush3.bf16.msra.mxu0 %v3564_v44  ;;  %2255 = vmatprep.mubr.msk.f32.mxu0 %vm3309_vm0, %v3310_v1 }
 0x1a8   :  { %2647 = vmatprep.subr.bf16.mxu0 %v3308_v0 }
 0x1ab   :  { %2649 = vmatpush3.bf16.msra.mxu0 %v3568_v48 }
 0x1ac   :  { %2650 = vmatprep.subr.bf16.mxu0 %v3308_v0 }
 0x1af   :  { %2652 = vmatpush3.bf16.msra.mxu0 %v3572_v52 }
 0x1b0   :  { %2653 = vmatprep.subr.bf16.mxu0 %v3308_v0 }
 0x1b3   :  { %2655 = vmatpush3.bf16.msra.mxu0 %v3576_v55 }
 0x1b4   :  { %2656 = vmatprep.subr.bf16.mxu0 %v3308_v0 }
 0x1b7   :  { %2658 = vmatpush3.bf16.msra.mxu0 %v3580_v59 }
 0x1b8   :  { %2659 = vmatprep.subr.bf16.mxu0 %v3308_v0 }
 0x1bb   :  { %2661 = vmatpush3.bf16.msra.mxu0 %v3584_v63 }
 0x1bc   :  { %2662 = vmatprep.subr.bf16.mxu0 %v3308_v0 }
 0x1bf   :  { %2664 = vmatpush3.bf16.msra.mxu0 %v3587_v4 }
 0x1c0   :  { %2665 = vmatprep.subr.bf16.mxu0 %v3308_v0 }
 0x1c3   :  { %2667 = vmatpush3.bf16.msra.mxu0 %v3591_v9 }
 0x1c4   :  { %2700 = vmatprep.subr.bf16.mxu0 %v3308_v0 }
 0x279   :  { %v747_v11 = vpop.f32.mrb[10].mxu0 }
 0x27a   :  { %v748_v13 = vadd.f32 %v747_v11, %v506_v33  ;;  %v2222_v14 = vpop.f32.mrb[11].mxu0 }
 0x27c   :  { %3058 = vtanh.f32 %v748_v13 }
 0x27d   :  { %3060 = vrcp.f32 %v754_v12 }
 0x286   :  { %v3059_v17 = vpop.eup %3058 }
 0x287   :  { %v758_v20 = vsub.f32 %v3059_v17, %v3470_v22  ;;  %v3061_v21 = vpop.eup %3060 }
 0x289   :  { %v759_v23 = vmul.f32 %v3061_v21, %v758_v20 }
 0x28b   :  { %v760_v25 = vadd.f32 %v759_v23, %v3470_v22 }
 0x28d   :  { %830 = vmatmul.mubr.f32.vlgmr.msra.gmra.mrb[2].mxu1 %v760_v25 }
 0x28e   :  { %2671 = vmatpush1.bf16.msra.mxu1 %v3472_v27  ;;  %991 = vmatprep.mubr.f32.mxu1 %v3310_v1 }
 0x28f   :  { %2673 = vmatprep.subr.bf16.mxu1 %v3476_v30 }
 0x292   :  { %2675 = vmatpush1.bf16.msra.mxu1 %v3482_v37 }
 0x293   :  { %2677 = vmatprep.subr.bf16.mxu1 %v3485_v40 }
 0x296   :  { %2679 = vmatpush1.bf16.msra.mxu1 %v3492_v47 }
 0x297   :  { %2681 = vmatprep.subr.bf16.mxu1 %v3495_v50 }
 0x29a   :  { %2683 = vmatpush1.bf16.msra.mxu1 %v3502_v57 }
 0x29b   :  { %2685 = vmatprep.subr.bf16.mxu1 %v3505_v60 }
 0x29e   :  { %2687 = vmatpush1.bf16.msra.mxu1 %v3510_v5 }
 0x29f   :  { %2689 = vmatprep.subr.bf16.mxu1 %v3513_v8 }
 0x2a2   :  { %2691 = vmatpush1.bf16.msra.mxu1 %v3517_v15 }
 0x2a3   :  { %2693 = vmatprep.subr.bf16.mxu1 %v3520_v18 }
 0x2a6   :  { %2695 = vmatpush1.bf16.msra.mxu1 %v3524_v28 }
 0x2a7   :  { %2697 = vmatprep.subr.bf16.mxu1 %v3527_v29 }
 0x2aa   :  { %2699 = vmatpush1.bf16.msra.mxu1 %v3531_v34 }
 0x2ab   :  { %2725 = vmatprep.subr.bf16.mxu1 %v3468_v19 }
 0x360   :  { %v831_v22 = vpop.f32.mrb[2].mxu1 }
 0x361   :  { %v833_v31 = vpop.f32.mrb[3].mxu1  ;;  %v3006_v43 = vadd.f32 %v831_v22, %v3599_v16 }
 0x362   :  { %v3007_v32 = vadd.f32 %v833_v31, %v3604_v24 }
 0x363   :  { %v1919_v38 = vmul.f32 -1.442695, %v3006_v43 }
 0x364   :  { %v1918_v33 = vmul.f32 -1.442695, %v3007_v32 }
 0x366   :  { %3062 = vpow2.f32 %v1918_v33 }
 0x370   :  { %v3063_v35 = vpop.eup %3062 }
 0x371   :  { %v839_v39 = vadd.f32 1.0, %v3063_v35 }
 0x373   :  { %3064 = vrcp.f32 %v839_v39 }
 0x374   :  { %3066 = vpow2.f32 %v1919_v38 }
 0x37d   :  { %v3065_v41 = vpop.eup %3064 }
 0x37e   :  { %v842_v36 = vmul.f32 %v3065_v41, %v760_v25  ;;  %v3067_v49 = vpop.eup %3066 }
 0x37f   :  { %v916_v56 = vadd.f32 1.0, %v3067_v49 }
 0x380   :  { %2256 = vmatmul.mubr.f32.vlgmr.msra.gmra.mrb[12].mxu0 %v842_v36 }
 0x381   :  { %2702 = vmatpush3.bf16.msra.mxu0 %v3564_v44  ;;  %2290 = vmatprep.mubr.msk.f32.mxu0 %vm3309_vm0, %v3310_v1 }
 0x382   :  { %2703 = vmatprep.subr.bf16.mxu0 %v3308_v0 }
 0x385   :  { %2705 = vmatpush3.bf16.msra.mxu0 %v3568_v48 }
 0x386   :  { %2706 = vmatprep.subr.bf16.mxu0 %v3308_v0 }
 0x389   :  { %2708 = vmatpush3.bf16.msra.mxu0 %v3572_v52 }
 0x38a   :  { %2709 = vmatprep.subr.bf16.mxu0 %v3308_v0 }
 0x38d   :  { %2711 = vmatpush3.bf16.msra.mxu0 %v3576_v55 }
 0x38e   :  { %2712 = vmatprep.subr.bf16.mxu0 %v3308_v0 }
 0x391   :  { %2714 = vmatpush3.bf16.msra.mxu0 %v3580_v59 }
 0x392   :  { %2715 = vmatprep.subr.bf16.mxu0 %v3308_v0 }
 0x395   :  { %2717 = vmatpush3.bf16.msra.mxu0 %v3584_v63 }
 0x396   :  { %2718 = vmatprep.subr.bf16.mxu0 %v3308_v0 }
 0x399   :  { %2720 = vmatpush3.bf16.msra.mxu0 %v3587_v4 }
 0x39a   :  { %2721 = vmatprep.subr.bf16.mxu0 %v3308_v0 }
 0x39d   :  { %2723 = vmatpush3.bf16.msra.mxu0 %v3591_v9 }
 0x39e   :  { %2756 = vmatprep.subr.bf16.mxu0 %v3308_v0 }
 0x453   :  { %v909_v53 = vpop.f32.mrb[12].mxu0 }
 0x454   :  { %v910_v61 = vadd.f32 %v909_v53, %v3606_v26  ;;  %v2257_v62 = vpop.f32.mrb[13].mxu0 }
 0x456   :  { %3068 = vtanh.f32 %v910_v61 }
 0x457   :  { %3070 = vrcp.f32 %v916_v56 }
 0x460   :  { %v3069_v2 = vpop.eup %3068 }
 0x461   :  { %v920_v3 = vsub.f32 %v3069_v2, %v760_v25  ;;  %v3071_v6 = vpop.eup %3070 }
 0x463   :  { %v921_v7 = vmul.f32 %v3071_v6, %v920_v3 }
 0x465   :  { %v922_v10 = vadd.f32 %v921_v7, %v760_v25 }
 0x467   :  { %992 = vmatmul.mubr.f32.vlgmr.msra.gmra.mrb[4].mxu1 %v922_v10 }
 0x468   :  { %2727 = vmatpush1.bf16.msra.mxu1 %v3472_v27  ;;  %1153 = vmatprep.mubr.f32.mxu1 %v3310_v1 }
 0x469   :  { %2729 = vmatprep.subr.bf16.mxu1 %v3476_v30 }
 0x46c   :  { %2731 = vmatpush1.bf16.msra.mxu1 %v3482_v37 }
 0x46d   :  { %2733 = vmatprep.subr.bf16.mxu1 %v3485_v40 }
 0x470   :  { %2735 = vmatpush1.bf16.msra.mxu1 %v3492_v47 }
 0x471   :  { %2737 = vmatprep.subr.bf16.mxu1 %v3495_v50 }
 0x474   :  { %2739 = vmatpush1.bf16.msra.mxu1 %v3502_v57 }
 0x475   :  { %2741 = vmatprep.subr.bf16.mxu1 %v3505_v60 }
 0x478   :  { %2743 = vmatpush1.bf16.msra.mxu1 %v3510_v5 }
 0x479   :  { %2745 = vmatprep.subr.bf16.mxu1 %v3513_v8 }
 0x47c   :  { %2747 = vmatpush1.bf16.msra.mxu1 %v3517_v15 }
 0x47d   :  { %2749 = vmatprep.subr.bf16.mxu1 %v3520_v18 }
 0x480   :  { %2751 = vmatpush1.bf16.msra.mxu1 %v3524_v28 }
 0x481   :  { %2753 = vmatprep.subr.bf16.mxu1 %v3527_v29 }
 0x484   :  { %2755 = vmatpush1.bf16.msra.mxu1 %v3531_v34 }
 0x485   :  { %2781 = vmatprep.subr.bf16.mxu1 %v3468_v19 }
 0x53a   :  { %v993_v26 = vpop.f32.mrb[4].mxu1 }
 0x53b   :  { %v995_v11 = vpop.f32.mrb[5].mxu1  ;;  %v3008_v23 = vadd.f32 %v993_v26, %v3599_v16 }
 0x53c   :  { %v3009_v12 = vadd.f32 %v995_v11, %v3604_v24 }
 0x53d   :  { %v1921_v25 = vmul.f32 -1.442695, %v3008_v23 }
 0x53e   :  { %v1920_v13 = vmul.f32 -1.442695, %v3009_v12 }
 0x540   :  { %3072 = vpow2.f32 %v1920_v13 }
 0x54a   :  { %v3073_v14 = vpop.eup %3072 }
 0x54b   :  { %v1001_v17 = vadd.f32 1.0, %v3073_v14 }
 0x54d   :  { %3074 = vrcp.f32 %v1001_v17 }
 0x54e   :  { %3076 = vpow2.f32 %v1921_v25 }
 0x557   :  { %v3075_v20 = vpop.eup %3074 }
 0x558   :  { %v1004_v21 = vmul.f32 %v3075_v20, %v922_v10  ;;  %v3077_v22 = vpop.eup %3076 }
 0x559   :  { %v1078_v32 = vadd.f32 1.0, %v3077_v22 }
 0x55a   :  { %2291 = vmatmul.mubr.f32.vlgmr.msra.gmra.mrb[14].mxu0 %v1004_v21 }
 0x55b   :  { %2758 = vmatpush3.bf16.msra.mxu0 %v3564_v44  ;;  %2325 = vmatprep.mubr.msk.f32.mxu0 %vm3309_vm0, %v3310_v1 }
 0x55c   :  { %2759 = vmatprep.subr.bf16.mxu0 %v3308_v0 }
 0x55f   :  { %2761 = vmatpush3.bf16.msra.mxu0 %v3568_v48 }
 0x560   :  { %2762 = vmatprep.subr.bf16.mxu0 %v3308_v0 }
 0x563   :  { %2764 = vmatpush3.bf16.msra.mxu0 %v3572_v52 }
 0x564   :  { %2765 = vmatprep.subr.bf16.mxu0 %v3308_v0 }
 0x567   :  { %2767 = vmatpush3.bf16.msra.mxu0 %v3576_v55 }
 0x568   :  { %2768 = vmatprep.subr.bf16.mxu0 %v3308_v0 }
 0x56b   :  { %2770 = vmatpush3.bf16.msra.mxu0 %v3580_v59 }
 0x56c   :  { %2771 = vmatprep.subr.bf16.mxu0 %v3308_v0 }
 0x56f   :  { %2773 = vmatpush3.bf16.msra.mxu0 %v3584_v63 }
 0x570   :  { %2774 = vmatprep.subr.bf16.mxu0 %v3308_v0 }
 0x573   :  { %2776 = vmatpush3.bf16.msra.mxu0 %v3587_v4 }
 0x574   :  { %2777 = vmatprep.subr.bf16.mxu0 %v3308_v0 }
 0x577   :  { %2779 = vmatpush3.bf16.msra.mxu0 %v3591_v9 }
 0x578   :  { %2812 = vmatprep.subr.bf16.mxu0 %v3308_v0 }
 0x62d   :  { %v1071_v31 = vpop.f32.mrb[14].mxu0 }
 0x62e   :  { %v1072_v33 = vadd.f32 %v1071_v31, %v3611_v45  ;;  %v2292_v35 = vpop.f32.mrb[15].mxu0 }
 0x630   :  { %3078 = vtanh.f32 %v1072_v33 }
 0x631   :  { %3080 = vrcp.f32 %v1078_v32 }
 0x63a   :  { %v3079_v39 = vpop.eup %3078 }
 0x63b   :  { %v1082_v41 = vsub.f32 %v3079_v39, %v922_v10  ;;  %v3081_v36 = vpop.eup %3080 }
 0x63d   :  { %v1083_v43 = vmul.f32 %v3081_v36, %v1082_v41 }
 0x63f   :  { %v1084_v38 = vadd.f32 %v1083_v43, %v922_v10 }
 0x641   :  { %1154 = vmatmul.mubr.f32.vlgmr.msra.gmra.mrb[6].mxu1 %v1084_v38 }
 0x642   :  { %2783 = vmatpush1.bf16.msra.mxu1 %v3472_v27  ;;  %1315 = vmatprep.mubr.f32.mxu1 %v3310_v1 }
 0x643   :  { %2785 = vmatprep.subr.bf16.mxu1 %v3476_v30 }
 0x646   :  { %2787 = vmatpush1.bf16.msra.mxu1 %v3482_v37 }
 0x647   :  { %2789 = vmatprep.subr.bf16.mxu1 %v3485_v40 }
 0x64a   :  { %2791 = vmatpush1.bf16.msra.mxu1 %v3492_v47 }
 0x64b   :  { %2793 = vmatprep.subr.bf16.mxu1 %v3495_v50 }
 0x64e   :  { %2795 = vmatpush1.bf16.msra.mxu1 %v3502_v57 }
 0x64f   :  { %2797 = vmatprep.subr.bf16.mxu1 %v3505_v60 }
 0x652   :  { %2799 = vmatpush1.bf16.msra.mxu1 %v3510_v5 }
 0x653   :  { %2801 = vmatprep.subr.bf16.mxu1 %v3513_v8 }
 0x656   :  { %2803 = vmatpush1.bf16.msra.mxu1 %v3517_v15 }
 0x657   :  { %2805 = vmatprep.subr.bf16.mxu1 %v3520_v18 }
 0x65a   :  { %2807 = vmatpush1.bf16.msra.mxu1 %v3524_v28 }
 0x65b   :  { %2809 = vmatprep.subr.bf16.mxu1 %v3527_v29 }
 0x65e   :  { %2811 = vmatpush1.bf16.msra.mxu1 %v3531_v34 }
 0x65f   :  { %2837 = vmatprep.subr.bf16.mxu1 %v3468_v19 }
 0x714   :  { %v1155_v45 = vpop.f32.mrb[6].mxu1 }
 0x715   :  { %v1157_v49 = vpop.f32.mrb[7].mxu1  ;;  %v3010_v6 = vadd.f32 %v1155_v45, %v3599_v16 }
 0x716   :  { %v3011_v53 = vadd.f32 %v1157_v49, %v3604_v24 }
 0x717   :  { %v1923_v7 = vmul.f32 -1.442695, %v3010_v6 }
 0x718   :  { %v1922_v56 = vmul.f32 -1.442695, %v3011_v53 }
 0x71a   :  { %3082 = vpow2.f32 %v1922_v56 }
 0x724   :  { %v3083_v61 = vpop.eup %3082 }
 0x725   :  { %v1163_v62 = vadd.f32 1.0, %v3083_v61 }
 0x727   :  { %3084 = vrcp.f32 %v1163_v62 }
 0x728   :  { %3086 = vpow2.f32 %v1923_v7 }
 0x731   :  { %v3085_v2 = vpop.eup %3084 }
 0x732   :  { %v1166_v3 = vmul.f32 %v3085_v2, %v1084_v38  ;;  %v3087_v10 = vpop.eup %3086 }
 0x733   :  { %v1240_v11 = vadd.f32 1.0, %v3087_v10 }
 0x734   :  { %2326 = vmatmul.mubr.f32.vlgmr.msra.gmra.mrb[16].mxu0 %v1166_v3 }
 0x735   :  { %2814 = vmatpush3.bf16.msra.mxu0 %v3564_v44  ;;  %2360 = vmatprep.mubr.msk.f32.mxu0 %vm3309_vm0, %v3310_v1 }
 0x736   :  { %2815 = vmatprep.subr.bf16.mxu0 %v3308_v0 }
 0x739   :  { %2817 = vmatpush3.bf16.msra.mxu0 %v3568_v48 }
 0x73a   :  { %2818 = vmatprep.subr.bf16.mxu0 %v3308_v0 }
 0x73d   :  { %2820 = vmatpush3.bf16.msra.mxu0 %v3572_v52 }
 0x73e   :  { %2821 = vmatprep.subr.bf16.mxu0 %v3308_v0 }
 0x741   :  { %2823 = vmatpush3.bf16.msra.mxu0 %v3576_v55 }
 0x742   :  { %2824 = vmatprep.subr.bf16.mxu0 %v3308_v0 }
 0x745   :  { %2826 = vmatpush3.bf16.msra.mxu0 %v3580_v59 }
 0x746   :  { %2827 = vmatprep.subr.bf16.mxu0 %v3308_v0 }
 0x749   :  { %2829 = vmatpush3.bf16.msra.mxu0 %v3584_v63 }
 0x74a   :  { %2830 = vmatprep.subr.bf16.mxu0 %v3308_v0 }
 0x74d   :  { %2832 = vmatpush3.bf16.msra.mxu0 %v3587_v4 }
 0x74e   :  { %2833 = vmatprep.subr.bf16.mxu0 %v3308_v0 }
 0x751   :  { %2835 = vmatpush3.bf16.msra.mxu0 %v3591_v9 }
 0x752   :  { %2868 = vmatprep.subr.bf16.mxu0 %v3308_v0 }
 0x807   :  { %v1233_v26 = vpop.f32.mrb[16].mxu0 }
 0x808   :  { %v1234_v12 = vadd.f32 %v1233_v26, %v3609_v42  ;;  %v2327_v13 = vpop.f32.mrb[17].mxu0 }
 0x80a   :  { %3088 = vtanh.f32 %v1234_v12 }
 0x80b   :  { %3090 = vrcp.f32 %v1240_v11 }
 0x814   :  { %v3089_v14 = vpop.eup %3088 }
 0x815   :  { %v1244_v17 = vsub.f32 %v3089_v14, %v1084_v38  ;;  %v3091_v20 = vpop.eup %3090 }
 0x817   :  { %v1245_v21 = vmul.f32 %v3091_v20, %v1244_v17 }
 0x819   :  { %v1246_v23 = vadd.f32 %v1245_v21, %v1084_v38 }
 0x81b   :  { %1316 = vmatmul.mubr.f32.vlgmr.msra.gmra.mrb[8].mxu1 %v1246_v23 }
 0x81c   :  { %2839 = vmatpush1.bf16.msra.mxu1 %v3472_v27  ;;  %1477 = vmatprep.mubr.f32.mxu1 %v3310_v1 }
 0x81d   :  { %2841 = vmatprep.subr.bf16.mxu1 %v3476_v30 }
 0x820   :  { %2843 = vmatpush1.bf16.msra.mxu1 %v3482_v37 }
 0x821   :  { %2845 = vmatprep.subr.bf16.mxu1 %v3485_v40 }
 0x824   :  { %2847 = vmatpush1.bf16.msra.mxu1 %v3492_v47 }
 0x825   :  { %2849 = vmatprep.subr.bf16.mxu1 %v3495_v50 }
 0x828   :  { %2851 = vmatpush1.bf16.msra.mxu1 %v3502_v57 }
 0x829   :  { %2853 = vmatprep.subr.bf16.mxu1 %v3505_v60 }
 0x82c   :  { %2855 = vmatpush1.bf16.msra.mxu1 %v3510_v5 }
 0x82d   :  { %2857 = vmatprep.subr.bf16.mxu1 %v3513_v8 }
 0x830   :  { %2859 = vmatpush1.bf16.msra.mxu1 %v3517_v15 }
 0x831   :  { %2861 = vmatprep.subr.bf16.mxu1 %v3520_v18 }
 0x834   :  { %2863 = vmatpush1.bf16.msra.mxu1 %v3524_v28 }
 0x835   :  { %2865 = vmatprep.subr.bf16.mxu1 %v3527_v29 }
 0x838   :  { %2867 = vmatpush1.bf16.msra.mxu1 %v3531_v34 }
 0x839   :  { %2893 = vmatprep.subr.bf16.mxu1 %v3468_v19 }
 0x8ee   :  { %v1317_v42 = vpop.f32.mrb[8].mxu1 }
 0x8ef   :  { %v1319_v25 = vpop.f32.mrb[9].mxu1  ;;  %v3012_v41 = vadd.f32 %v1317_v42, %v3599_v16 }
 0x8f0   :  { %v3013_v22 = vadd.f32 %v1319_v25, %v3604_v24 }
 0x8f1   :  { %v1925_v36 = vmul.f32 -1.442695, %v3012_v41 }
 0x8f2   :  { %v1924_v31 = vmul.f32 -1.442695, %v3013_v22 }
 0x8f4   :  { %3092 = vpow2.f32 %v1924_v31 }
 0x8fe   :  { %v3093_v32 = vpop.eup %3092 }
 0x8ff   :  { %v1325_v33 = vadd.f32 1.0, %v3093_v32 }
 0x901   :  { %3094 = vrcp.f32 %v1325_v33 }
 0x902   :  { %3096 = vpow2.f32 %v1925_v36 }
 0x90b   :  { %v3095_v35 = vpop.eup %3094 }
 0x90c   :  { %v1328_v39 = vmul.f32 %v3095_v35, %v1246_v23  ;;  %v3097_v43 = vpop.eup %3096 }
 0x90d   :  { %v1402_v45 = vadd.f32 1.0, %v3097_v43 }
 0x90e   :  { %2361 = vmatmul.mubr.f32.vlgmr.msra.gmra.mrb[18].mxu0 %v1328_v39 }
 0x90f   :  { %2870 = vmatpush3.bf16.msra.mxu0 %v3564_v44  ;;  %2395 = vmatprep.mubr.msk.f32.mxu0 %vm3309_vm0, %v3310_v1 }
 0x910   :  { %2871 = vmatprep.subr.bf16.mxu0 %v3308_v0 }
 0x913   :  { %2873 = vmatpush3.bf16.msra.mxu0 %v3568_v48 }
 0x914   :  { %2874 = vmatprep.subr.bf16.mxu0 %v3308_v0 }
 0x917   :  { %2876 = vmatpush3.bf16.msra.mxu0 %v3572_v52 }
 0x918   :  { %2877 = vmatprep.subr.bf16.mxu0 %v3308_v0 }
 0x91b   :  { %2879 = vmatpush3.bf16.msra.mxu0 %v3576_v55 }
 0x91c   :  { %2880 = vmatprep.subr.bf16.mxu0 %v3308_v0 }
 0x91f   :  { %2882 = vmatpush3.bf16.msra.mxu0 %v3580_v59 }
 0x920   :  { %2883 = vmatprep.subr.bf16.mxu0 %v3308_v0 }
 0x923   :  { %2885 = vmatpush3.bf16.msra.mxu0 %v3584_v63 }
 0x924   :  { %2886 = vmatprep.subr.bf16.mxu0 %v3308_v0 }
 0x927   :  { %2888 = vmatpush3.bf16.msra.mxu0 %v3587_v4 }
 0x928   :  { %2889 = vmatprep.subr.bf16.mxu0 %v3308_v0 }
 0x92b   :  { %2891 = vmatpush3.bf16.msra.mxu0 %v3591_v9 }
 0x92c   :  { %2924 = vmatprep.subr.bf16.mxu0 %v3308_v0 }
 0x9e1   :  { %v1395_v38 = vpop.f32.mrb[18].mxu0 }
 0x9e2   :  { %v1396_v49 = vadd.f32 %v1395_v38, %v3615_v51  ;;  %v2362_v53 = vpop.f32.mrb[19].mxu0 }
 0x9e4   :  { %3098 = vtanh.f32 %v1396_v49 }
 0x9e5   :  { %3100 = vrcp.f32 %v1402_v45 }
 0x9ee   :  { %v3099_v56 = vpop.eup %3098 }
 0x9ef   :  { %v1406_v61 = vsub.f32 %v3099_v56, %v1246_v23  ;;  %v3101_v62 = vpop.eup %3100 }
 0x9f1   :  { %v1407_v2 = vmul.f32 %v3101_v62, %v1406_v61 }
 0x9f3   :  { %v1408_v3 = vadd.f32 %v1407_v2, %v1246_v23 }
 0x9f5   :  { %1478 = vmatmul.mubr.f32.vlgmr.msra.gmra.mrb[10].mxu1 %v1408_v3 }
 0x9f6   :  { %2895 = vmatpush1.bf16.msra.mxu1 %v3472_v27  ;;  %1639 = vmatprep.mubr.f32.mxu1 %v3310_v1 }
 0x9f7   :  { %2897 = vmatprep.subr.bf16.mxu1 %v3476_v30 }
 0x9fa   :  { %2899 = vmatpush1.bf16.msra.mxu1 %v3482_v37 }
 0x9fb   :  { %2901 = vmatprep.subr.bf16.mxu1 %v3485_v40 }
 0x9fe   :  { %2903 = vmatpush1.bf16.msra.mxu1 %v3492_v47 }
 0x9ff   :  { %2905 = vmatprep.subr.bf16.mxu1 %v3495_v50 }
 0xa02   :  { %2907 = vmatpush1.bf16.msra.mxu1 %v3502_v57 }
 0xa03   :  { %2909 = vmatprep.subr.bf16.mxu1 %v3505_v60 }
 0xa06   :  { %2911 = vmatpush1.bf16.msra.mxu1 %v3510_v5 }
 0xa07   :  { %2913 = vmatprep.subr.bf16.mxu1 %v3513_v8 }
 0xa0a   :  { %2915 = vmatpush1.bf16.msra.mxu1 %v3517_v15 }
 0xa0b   :  { %2917 = vmatprep.subr.bf16.mxu1 %v3520_v18 }
 0xa0e   :  { %2919 = vmatpush1.bf16.msra.mxu1 %v3524_v28 }
 0xa0f   :  { %2921 = vmatprep.subr.bf16.mxu1 %v3527_v29 }
 0xa12   :  { %2923 = vmatpush1.bf16.msra.mxu1 %v3531_v34 }
 0xa13   :  { %2949 = vmatprep.subr.bf16.mxu1 %v3468_v19 }
 0xac8   :  { %v1479_v51 = vpop.f32.mrb[10].mxu1 }
 0xac9   :  { %v1481_v6 = vpop.f32.mrb[11].mxu1  ;;  %v3014_v19 = vadd.f32 %v1479_v51, %v3599_v16 }
 0xaca   :  { %v3015_v7 = vadd.f32 %v1481_v6, %v3604_v24 }
 0xacb   :  { %v1927_v14 = vmul.f32 -1.442695, %v3014_v19 }
 0xacc   :  { %v1926_v10 = vmul.f32 -1.442695, %v3015_v7 }
 0xace   :  { %3102 = vpow2.f32 %v1926_v10 }
 0xad8   :  { %v3103_v26 = vpop.eup %3102 }
 0xad9   :  { %v1487_v11 = vadd.f32 1.0, %v3103_v26 }
 0xadb   :  { %3104 = vrcp.f32 %v1487_v11 }
 0xadc   :  { %3106 = vpow2.f32 %v1927_v14 }
 0xae5   :  { %v3105_v12 = vpop.eup %3104 }
 0xae6   :  { %v1490_v13 = vmul.f32 %v3105_v12, %v1408_v3  ;;  %v3107_v17 = vpop.eup %3106 }
 0xae7   :  { %v1564_v21 = vadd.f32 1.0, %v3107_v17 }
 0xae8   :  { %2396 = vmatmul.mubr.f32.vlgmr.msra.gmra.mrb[20].mxu0 %v1490_v13 }
 0xae9   :  { %2926 = vmatpush3.bf16.msra.mxu0 %v3564_v44  ;;  %2430 = vmatprep.mubr.msk.f32.mxu0 %vm3309_vm0, %v3310_v1 }
 0xaea   :  { %2927 = vmatprep.subr.bf16.mxu0 %v3308_v0 }
 0xaed   :  { %2929 = vmatpush3.bf16.msra.mxu0 %v3568_v48 }
 0xaee   :  { %2930 = vmatprep.subr.bf16.mxu0 %v3308_v0 }
 0xaf1   :  { %2932 = vmatpush3.bf16.msra.mxu0 %v3572_v52 }
 0xaf2   :  { %2933 = vmatprep.subr.bf16.mxu0 %v3308_v0 }
 0xaf5   :  { %2935 = vmatpush3.bf16.msra.mxu0 %v3576_v55 }
 0xaf6   :  { %2936 = vmatprep.subr.bf16.mxu0 %v3308_v0 }
 0xaf9   :  { %2938 = vmatpush3.bf16.msra.mxu0 %v3580_v59 }
 0xafa   :  { %2939 = vmatprep.subr.bf16.mxu0 %v3308_v0 }
 0xafd   :  { %2941 = vmatpush3.bf16.msra.mxu0 %v3584_v63 }
 0xafe   :  { %2942 = vmatprep.subr.bf16.mxu0 %v3308_v0 }
 0xb01   :  { %2944 = vmatpush3.bf16.msra.mxu0 %v3587_v4 }
 0xb02   :  { %2945 = vmatprep.subr.bf16.mxu0 %v3308_v0 }
 0xb05   :  { %2947 = vmatpush3.bf16.msra.mxu0 %v3591_v9 }
 0xb06   :  { %2980 = vmatprep.subr.bf16.mxu0 %v3308_v0 }
 0xbbb   :  { %v1557_v20 = vpop.f32.mrb[20].mxu0 }
 0xbbc   :  { %v1558_v23 = vadd.f32 %v1557_v20, %v3613_v46  ;;  %v2397_v42 = vpop.f32.mrb[21].mxu0 }
 0xbbe   :  { %3108 = vtanh.f32 %v1558_v23 }
 0xbbf   :  { %3110 = vrcp.f32 %v1564_v21 }
 0xbc8   :  { %v3109_v25 = vpop.eup %3108 }
 0xbc9   :  { %v1568_v22 = vsub.f32 %v3109_v25, %v1408_v3  ;;  %v3111_v31 = vpop.eup %3110 }
 0xbcb   :  { %v1569_v32 = vmul.f32 %v3111_v31, %v1568_v22 }
 0xbcd   :  { %v1570_v33 = vadd.f32 %v1569_v32, %v1408_v3 }
 0xbcf   :  { %1640 = vmatmul.mubr.f32.vlgmr.msra.gmra.mrb[12].mxu1 %v1570_v33 }
 0xbd0   :  { %2951 = vmatpush1.bf16.msra.mxu1 %v3472_v27  ;;  %1801 = vmatprep.mubr.f32.mxu1 %v3310_v1 }
 0xbd1   :  { %2953 = vmatprep.subr.bf16.mxu1 %v3476_v30 }
 0xbd4   :  { %2955 = vmatpush1.bf16.msra.mxu1 %v3482_v37 }
 0xbd5   :  { %2957 = vmatprep.subr.bf16.mxu1 %v3485_v40 }
 0xbd8   :  { %2959 = vmatpush1.bf16.msra.mxu1 %v3492_v47 }
 0xbd9   :  { %2961 = vmatprep.subr.bf16.mxu1 %v3495_v50 }
 0xbdc   :  { %2963 = vmatpush1.bf16.msra.mxu1 %v3502_v57 }
 0xbdd   :  { %2965 = vmatprep.subr.bf16.mxu1 %v3505_v60 }
 0xbe0   :  { %2967 = vmatpush1.bf16.msra.mxu1 %v3510_v5 }
 0xbe1   :  { %2969 = vmatprep.subr.bf16.mxu1 %v3513_v8 }
 0xbe4   :  { %2971 = vmatpush1.bf16.msra.mxu1 %v3517_v15 }
 0xbe5   :  { %2973 = vmatprep.subr.bf16.mxu1 %v3520_v18 }
 0xbe8   :  { %2975 = vmatpush1.bf16.msra.mxu1 %v3524_v28 }
 0xbe9   :  { %2977 = vmatprep.subr.bf16.mxu1 %v3527_v29 }
 0xbec   :  { %2979 = vmatpush1.bf16.msra.mxu1 %v3531_v34 }
 0xca2   :  { %v1641_v27 = vpop.f32.mrb[12].mxu1 }
 0xca3   :  { %v1643_v30 = vpop.f32.mrb[13].mxu1 }
 0xca4   :  { %v3017_v37 = vadd.f32 %v1643_v30, %v3604_v24 }
 0xca6   :  { %v1928_v40 = vmul.f32 -1.442695, %v3017_v37 }
 0xca8   :  { %3112 = vpow2.f32 %v1928_v40 }
 0xcb2   :  { %v3113_v47 = vpop.eup %3112 }
 0xcb3   :  { %v1649_v50 = vadd.f32 1.0, %v3113_v47 }
 0xcb5   :  { %3114 = vrcp.f32 %v1649_v50 }
 0xcbf   :  { %v3115_v57 = vpop.eup %3114 }
 0xcc0   :  { %v1652_v60 = vmul.f32 %v3115_v57, %v1570_v33 }
 0xcc2   :  { %2431 = vmatmul.mubr.f32.vlgmr.msra.gmra.mrb[22].mxu0 %v1652_v60 }
 0xcc3   :  { %2982 = vmatpush3.bf16.msra.mxu0 %v3564_v44  ;;  %2465 = vmatprep.mubr.msk.f32.mxu0 %vm3309_vm0, %v3310_v1  ;;  %v3016_v1 = vadd.f32 %v1641_v27, %v3599_v16 }
 0xcc4   :  { %2983 = vmatprep.subr.bf16.mxu0 %v3308_v0 }
 0xcc5   :  { %v1929_v5 = vmul.f32 -1.442695, %v3016_v1 }
 0xcc7   :  { %2985 = vmatpush3.bf16.msra.mxu0 %v3568_v48  ;;  %3116 = vpow2.f32 %v1929_v5 }
 0xcc8   :  { %2986 = vmatprep.subr.bf16.mxu0 %v3308_v0 }
 0xccb   :  { %2988 = vmatpush3.bf16.msra.mxu0 %v3572_v52 }
 0xccc   :  { %2989 = vmatprep.subr.bf16.mxu0 %v3308_v0 }
 0xccf   :  { %2991 = vmatpush3.bf16.msra.mxu0 %v3576_v55 }
 0xcd0   :  { %2992 = vmatprep.subr.bf16.mxu0 %v3308_v0 }
 0xcd1   :  { %v3117_v8 = vpop.eup %3116 }
 0xcd2   :  { %v1726_v18 = vadd.f32 1.0, %v3117_v8 }
 0xcd3   :  { %2994 = vmatpush3.bf16.msra.mxu0 %v3580_v59 }
 0xcd4   :  { %2995 = vmatprep.subr.bf16.mxu0 %v3308_v0 }
 0xcd7   :  { %2997 = vmatpush3.bf16.msra.mxu0 %v3584_v63 }
 0xcd8   :  { %2998 = vmatprep.subr.bf16.mxu0 %v3308_v0 }
 0xcdb   :  { %3000 = vmatpush3.bf16.msra.mxu0 %v3587_v4 }
 0xcdc   :  { %3001 = vmatprep.subr.bf16.mxu0 %v3308_v0 }
 0xcdf   :  { %3003 = vmatpush3.bf16.msra.mxu0 %v3591_v9 }
 0xd95   :  { %v1719_v15 = vpop.f32.mrb[22].mxu0 }
 0xd96   :  { %v1720_v28 = vadd.f32 %v1719_v15, %v3619_v58  ;;  %v2432_v29 = vpop.f32.mrb[23].mxu0 }
 0xd98   :  { %3118 = vtanh.f32 %v1720_v28 }
 0xd99   :  { %3120 = vrcp.f32 %v1726_v18 }
 0xda2   :  { %v3119_v34 = vpop.eup %3118 }
 0xda3   :  { %v1730_v44 = vsub.f32 %v3119_v34, %v1570_v33  ;;  %v3121_v48 = vpop.eup %3120 }
 0xda5   :  { %v1731_v52 = vmul.f32 %v3121_v48, %v1730_v44 }
 0xda7   :  { %v1732_v55 = vadd.f32 %v1731_v52, %v1570_v33 }
 0xda9   :  { %1802 = vmatmul.mubr.f32.vlgmr.msra.gmra.mrb[14].mxu1 %v1732_v55 }
 0xe7c   :  { %v1803_v0 = vpop.f32.mrb[14].mxu1 }
 0xe7d   :  { %v1805_v59 = vpop.f32.mrb[15].mxu1  ;;  %v3018_v39 = vadd.f32 %v1803_v0, %v3599_v16 }
 0xe7e   :  { %v3019_v63 = vadd.f32 %v1805_v59, %v3604_v24 }
 0xe7f   :  { %v1931_v41 = vmul.f32 -1.442695, %v3018_v39 }
 0xe80   :  { %v1930_v4 = vmul.f32 -1.442695, %v3019_v63 }
 0xe82   :  { %3122 = vpow2.f32 %v1930_v4 }
 0xe8c   :  { %v3123_v9 = vpop.eup %3122 }
 0xe8d   :  { %v1811_v46 = vadd.f32 1.0, %v3123_v9 }
 0xe8f   :  { %3124 = vrcp.f32 %v1811_v46 }
 0xe90   :  { %3126 = vpow2.f32 %v1931_v41 }
 0xe99   :  { %v3125_v35 = vpop.eup %3124 }
 0xe9a   :  { %v1814_v58 = vmul.f32 %v3125_v35, %v1732_v55  ;;  %v3127_v36 = vpop.eup %3126 }
 0xe9b   :  { %v1888_v38 = vadd.f32 1.0, %v3127_v36 }
 0xe9c   :  { %2466 = vmatmul.mubr.f32.vlgmr.msra.gmra.mrb[24].mxu0 %v1814_v58 }
 0xf6f   :  { %v1881_v43 = vpop.f32.mrb[24].mxu0 }
 0xf70   :  { %v1882_v45 = vadd.f32 %v1881_v43, %v3617_v54  ;;  %v2467_v49 = vpop.f32.mrb[25].mxu0 }
 0xf72   :  { %3128 = vtanh.f32 %v1882_v45 }
 0xf73   :  { %3130 = vrcp.f32 %v1888_v38 }
 0xf7c   :  { %v3129_v24 = vpop.eup %3128 }
 0xf7d   :  { %v1892_v53 = vsub.f32 %v3129_v24, %v1732_v55  ;;  %v3131_v56 = vpop.eup %3130 }
 0xf7f   :  { %v1893_v61 = vmul.f32 %v3131_v56, %v1892_v53 }
 0xf81   :  { %v1894_v62 = vadd.f32 %v1893_v61, %v1732_v55 }
 0xf83   :  { %1895 = vst [vmem:[#allocation14] sm:$0xff] %v1894_v62 }
 0xf84   :  { %3275 = shalt.err (!%p3272_p10)
}
 0xf85   :  { %s3276_s23 = scalar_lea.hbm %s3893_s9, 128 }
 0xf86   :  { %p3277_p11 = scmp.ne.s32.totalorder %s3893_s9, %s3276_s23  ;;  %p3280_p12 = scmp.lt.u32.totalorder %s3276_s23, %s3893_s9 }
 0xf88   :  { %p3282_p13 = pnand %p3280_p12, %p3277_p11 }
 0xf8a   :  { %3285 = shalt.err (!%p3282_p13)
}
 0xf8b   :  { %1905 = dma.vmem_to_hbm [thread:$0]  %s1903_s8, 128, %s3893_s9, [#allocation5]  }
 0xf8c   :  { %3294 = dma.done.wait [#allocation5], 128  }
 0xf8d   :  { %3295 = vsyncadd [#allocation5], 4294967168 }
 0xf8e   :  { %1909 = vsyncpa [#allocation4], 1 }
 0xf8f   :  { %1910 = vsyncpa [#allocation7], 1 }
 0xf90   :  { %1911 = vsyncpa [#allocation10], 1 }
 0xf91   :  { %1912 = vsyncpa [#allocation13], 1 }
 0xf92   :  { %1913 = vsyncpa [#allocation5], 1 }

</bundles_post_ra>
